<compile_context>
chip_gen: v7x
topology: tpu7x:2x2x1
jax: 0.10.0
libtpu: 0.0.40
codegen_flags: <defaults>
</compile_context>

<pallas_src>
import jax
import jax.numpy as jnp
from jax.experimental import pallas as pl
from jax.experimental.pallas import tpu as pltpu


# ------------------------------ Pallas kernel --------------------------------
def _vq_kernel(x_ref, e_ref, et_ref, q_ref, dw_ref, cnt_ref, sq_ref):
    # x_ref  : (B, G, D, HW)  activations, lane-dense on HW
    # e_ref  : (G, M, D)      codebooks (one row per code)
    # et_ref : (G, D, M)      codebooks transposed
    # q_ref  : (B, G, D, HW)  quantized, lane-dense on HW
    # dw_ref : (G, D, M)      EMA numerator (transposed), lane-dense on M
    # cnt_ref: (G, 1, M)      code-usage counts, lane-dense on M
    # sq_ref : (1, 1, 1)      sum((x - q)^2) for this grid step
    B, G, D, HW = x_ref.shape
    M = e_ref.shape[1]

    iota_m = jax.lax.broadcasted_iota(jnp.int32, (M, HW), 0)
    ones_row = jnp.ones((1, HW), jnp.float32)
    nt_dims = (((1,), (1,)), ((), ()))        # contract the shared HW axis

    def codebook_body(g, sq_total):
        e_g = e_ref[g]                                          # (M, D)
        et_g = et_ref[g]                                        # (D, M)
        e2_g = jnp.sum(e_g * e_g, axis=1, keepdims=True)        # (M, 1)

        def chunk_body(b, carry):
            dw_acc, cnt_acc, sq_acc = carry
            x_c = x_ref[b, g]                                   # (D, HW)

            # distances up to the per-column ||x||^2 constant (argmin
            # invariant).  D = 4, so VPU broadcast-FMAs; the MXU is reserved
            # for the gather / stats matmuls where K is large.
            cross = e_g[:, 0:1] * x_c[0:1, :]                   # (M, HW)
            for d in range(1, D):
                cross = cross + e_g[:, d:d + 1] * x_c[d:d + 1, :]
            scores = e2_g - 2.0 * cross                         # (M, HW)

            # argmin over codes, first index on ties (torch.argmin style).
            min_s = jnp.min(scores, axis=0, keepdims=True)      # (1, HW)
            idx = jnp.min(jnp.where(scores == min_s, iota_m, M),
                          axis=0, keepdims=True)                # (1, HW)
            enc_t = (iota_m == idx).astype(jnp.float32)         # (M, HW)

            # codebook gather as a lane-dense MXU matmul.
            q_c = jnp.dot(et_g, enc_t,
                          preferred_element_type=jnp.float32)   # (D, HW)
            q_ref[b, g] = q_c

            # EMA statistics, lane-dense on M (contract the HW axis).
            dw_acc = dw_acc + jax.lax.dot_general(
                x_c, enc_t, nt_dims,
                preferred_element_type=jnp.float32)             # (D, M)
            cnt_acc = cnt_acc + jax.lax.dot_general(
                ones_row, enc_t, nt_dims,
                preferred_element_type=jnp.float32)             # (1, M)

            diff = x_c - q_c
            sq_acc = sq_acc + jnp.sum(diff * diff)
            return dw_acc, cnt_acc, sq_acc

        init = (jnp.zeros((D, M), jnp.float32),
                jnp.zeros((1, M), jnp.float32),
                jnp.zeros((), jnp.float32))
        dw_g, cnt_g, sq_g = jax.lax.fori_loop(0, B, chunk_body, init)
        dw_ref[g] = dw_g
        cnt_ref[g] = cnt_g
        return sq_total + sq_g

    sq_total = jax.lax.fori_loop(0, G, codebook_body,
                                 jnp.zeros((), jnp.float32))
    sq_ref[...] = jnp.reshape(sq_total, (1, 1, 1))


# ------------------------------- wrapper --------------------------------------
def vq_embedding_ema_forward(x, embedding, ema_count, ema_weight, *,
                             commitment_cost=0.25, decay=0.999, epsilon=1e-5,
                             training=False):
    """Forward of VQEmbeddingEMA.  Returns (quantized, loss, perplexity_sum,
    new_buffers) where new_buffers = (embedding, ema_count, ema_weight) when
    training else None (PyTorch mutates these buffers in place)."""
    B, C, H, W = x.shape
    N, M, D = embedding.shape
    assert C == N * D
    HW = H * W
    R = B * HW
    assert HW % 128 == 0, "H*W must be lane-aligned (multiple of 128)"

    num_groups = 2 if (N % 2 == 0 and N >= 2) else 1
    G = N // num_groups

    # Free layout plumbing: pure reshapes (no data movement) + a 16 KiB
    # codebook transpose.
    x4 = x.reshape(B, N, D, HW).astype(jnp.float32)           # (B, N, D, HW)
    e = embedding.astype(jnp.float32)                         # (N, M, D)
    e_t = jnp.transpose(e, (0, 2, 1))                         # (N, D, M)

    q4, dw_t, cnt, sqerr = pl.pallas_call(
        _vq_kernel,
        grid=(num_groups,),
        in_specs=[
            pl.BlockSpec((B, G, D, HW), lambda i: (0, i, 0, 0)),
            pl.BlockSpec((G, M, D), lambda i: (i, 0, 0)),
            pl.BlockSpec((G, D, M), lambda i: (i, 0, 0)),
        ],
        out_specs=[
            pl.BlockSpec((B, G, D, HW), lambda i: (0, i, 0, 0)),
            pl.BlockSpec((G, D, M), lambda i: (i, 0, 0)),
            pl.BlockSpec((G, 1, M), lambda i: (i, 0, 0)),
            pl.BlockSpec((1, 1, 1), lambda i: (i, 0, 0)),
        ],
        out_shape=[
            jax.ShapeDtypeStruct((B, N, D, HW), jnp.float32),   # quantized
            jax.ShapeDtypeStruct((N, D, M), jnp.float32),       # dw^T
            jax.ShapeDtypeStruct((N, 1, M), jnp.float32),       # usage counts
            jax.ShapeDtypeStruct((num_groups, 1, 1), jnp.float32),  # sum sq err
        ],
        compiler_params=pltpu.CompilerParams(
            dimension_semantics=("parallel",)),
    )(x4, e, e_t)

    # Straight-through estimator: forward value is exactly `quantized`.
    # TODO(synk): no custom VJP is attached to the pallas_call; gradients for a
    # training graph would need one (x + stop_gradient(q - x)).
    quantized = q4.reshape(B, C, H, W)                        # pure reshape
    loss = commitment_cost * jnp.sum(sqerr) / (N * R * D)

    counts = cnt[:, 0, :]                                     # (N, M)
    avg_probs = counts / R
    perplexity_sum = jnp.sum(
        jnp.exp(-jnp.sum(avg_probs * jnp.log(avg_probs + 1e-10), axis=-1)))

    if not training:
        return quantized, loss, perplexity_sum, None

    dw = jnp.swapaxes(dw_t, 1, 2)                             # (N, M, D), 16 KiB
    new_count = decay * ema_count + (1.0 - decay) * counts
    n_tot = jnp.sum(new_count, axis=-1, keepdims=True)
    new_count = (new_count + epsilon) / (n_tot + M * epsilon) * n_tot
    new_weight = decay * ema_weight + (1.0 - decay) * dw
    new_embedding = new_weight / new_count[..., None]
    return quantized, loss, perplexity_sum, (new_embedding, new_count, new_weight)


# --------------------------- pure-JAX reference --------------------------------
def vq_reference(x, embedding, ema_count, ema_weight, *,
                 commitment_cost=0.25, decay=0.999, epsilon=1e-5, training=False):
    B, C, H, W = x.shape
    N, M, D = embedding.shape
    R = B * H * W
    xr = x.reshape(B, N, D, H, W).transpose(1, 0, 3, 4, 2)   # (N, B, H, W, D)
    x_flat = xr.reshape(N, R, D).astype(jnp.float32)
    x_t = jnp.swapaxes(x_flat, 1, 2)                         # (N, D, R)

    e2 = jnp.sum(embedding * embedding, axis=-1)             # (N, M)
    # Same score expression as the kernel (exact in f32 on the grid-snapped
    # test inputs, so nearest-code decisions agree deterministically).  The
    # per-row ||x||^2 constant is omitted: it cannot change the argmin.
    cross = embedding[:, :, 0:1] * x_t[:, 0:1, :]            # (N, M, R)
    for d in range(1, D):
        cross = cross + embedding[:, :, d:d + 1] * x_t[:, d:d + 1, :]
    scores = e2[:, :, None] - 2.0 * cross                    # (N, M, R)
    min_s = jnp.min(scores, axis=1, keepdims=True)
    iota_m = jax.lax.broadcasted_iota(jnp.int32, scores.shape, 1)
    idx = jnp.min(jnp.where(scores == min_s, iota_m, M), axis=1)   # (N, R)

    enc = jax.nn.one_hot(idx, M, dtype=jnp.float32)          # (N, R, M)
    quantized = jnp.take_along_axis(
        embedding, jnp.broadcast_to(idx[..., None], (N, R, D)), axis=1)

    e_latent = jnp.mean((x_flat - quantized) ** 2)
    loss = commitment_cost * e_latent
    avg_probs = jnp.mean(enc, axis=1)
    perplexity = jnp.exp(-jnp.sum(avg_probs * jnp.log(avg_probs + 1e-10), axis=-1))
    out = (quantized.reshape(N, B, H, W, D)
           .transpose(1, 0, 4, 2, 3).reshape(B, C, H, W))

    if not training:
        return out, loss, jnp.sum(perplexity), None
    counts = jnp.sum(enc, axis=1)
    new_count = decay * ema_count + (1.0 - decay) * counts
    n_tot = jnp.sum(new_count, axis=-1, keepdims=True)
    new_count = (new_count + epsilon) / (n_tot + M * epsilon) * n_tot
    dw = jnp.einsum('nrm,nrd->nmd', enc, x_flat)
    new_weight = decay * ema_weight + (1.0 - decay) * dw
    new_embedding = new_weight / new_count[..., None]
    return out, loss, jnp.sum(perplexity), (new_embedding, new_count, new_weight)


# TODO(synk): the standalone quantize(prior_logits) helper and the
# self.distances buffer side-effect of the PyTorch module are not implemented
# (not part of the forward() return values).

if __name__ == "__main__":
    key = jax.random.PRNGKey(0)
    kx, ke = jax.random.split(key)

    B, H, W = 2, 16, 16
    latent_dim, num_embeddings, embedding_dim = 8, 128, 4
    C = latent_dim * embedding_dim
    commitment_cost, decay, epsilon = 0.25, 0.999, 1e-5

    # Snap inputs to coarse dyadic grids so every score is exact in f32 and the
    # kernel/reference nearest-code decisions match deterministically (no
    # last-ulp tie flakiness in the test).
    x = jax.random.normal(kx, (B, C, H, W), jnp.float32)
    x = jnp.round(x * 256.0) / 256.0
    emb = jax.random.uniform(ke, (latent_dim, num_embeddings, embedding_dim),
                             jnp.float32,
                             -1.0 / num_embeddings, 1.0 / num_embeddings)
    emb = jnp.round(emb * 1024.0) / 1024.0
    ema_count = jnp.zeros((latent_dim, num_embeddings), jnp.float32)
    ema_weight = emb

    fwd = jax.jit(lambda a, b, c, d: vq_embedding_ema_forward(
        a, b, c, d, commitment_cost=commitment_cost, decay=decay,
        epsilon=epsilon, training=True))

    out = jax.block_until_ready(fwd(x, emb, ema_count, ema_weight))
    q, loss, ppl, (new_emb, new_cnt, new_w) = out

    ref_q, ref_loss, ref_ppl, (ref_emb, ref_cnt, ref_w) = vq_reference(
        x, emb, ema_count, ema_weight, commitment_cost=commitment_cost,
        decay=decay, epsilon=epsilon, training=True)

    assert q.shape == (B, C, H, W), q.shape
    checks = {
        "quantized": bool(jnp.allclose(q, ref_q, rtol=1e-5, atol=1e-5)),
        "loss": bool(jnp.allclose(loss, ref_loss, rtol=1e-4, atol=1e-6)),
        "perplexity": bool(jnp.allclose(ppl, ref_ppl, rtol=1e-3, atol=1e-2)),
        "ema_count": bool(jnp.allclose(new_cnt, ref_cnt, rtol=1e-5, atol=1e-6)),
        "ema_weight": bool(jnp.allclose(new_w, ref_w, rtol=1e-3, atol=1e-4)),
        "embedding": bool(jnp.allclose(new_emb, ref_emb, rtol=1e-3, atol=1e-3)),
    }
    assert all(checks.values()), {
        **checks,
        "max|q|": float(jnp.max(jnp.abs(q - ref_q))),
        "d_loss": float(jnp.abs(loss - ref_loss)),
        "d_ppl": float(jnp.abs(ppl - ref_ppl)),
        "max|emb|": float(jnp.max(jnp.abs(new_emb - ref_emb))),
    }
    print("KERNEL_OK")
</pallas_src>

<mosaic_0001>
module attributes {stable_mosaic.version = 11 : i64} {
  func.func @_vq_kernel(%arg0: i32, %arg1: memref<2x4x4x256xf32, #tpu.memory_space<vmem>>, %arg2: memref<4x128x4xf32, #tpu.memory_space<vmem>>, %arg3: memref<4x4x128xf32, #tpu.memory_space<vmem>>, %arg4: memref<2x4x4x256xf32, #tpu.memory_space<vmem>>, %arg5: memref<4x4x128xf32, #tpu.memory_space<vmem>>, %arg6: memref<4x1x128xf32, #tpu.memory_space<vmem>>, %arg7: memref<1x1x1xf32, #tpu.memory_space<vmem>>) attributes {dimension_semantics = [#tpu.dimension_semantics<parallel>], iteration_bounds = array<i64: 2>, scalar_prefetch = 0 : i64, scratch_operands = 0 : i64, tpu.core_type = #tpu.core_type<tc>, window_params = [{transform_indices = @transform_0, window_bounds = array<i64: 2, 4, 4, 256>}, {transform_indices = @transform_1, window_bounds = array<i64: 4, 128, 4>}, {transform_indices = @transform_2, window_bounds = array<i64: 4, 4, 128>}, {transform_indices = @transform_3, window_bounds = array<i64: 2, 4, 4, 256>}, {transform_indices = @transform_4, window_bounds = array<i64: 4, 4, 128>}, {transform_indices = @transform_5, window_bounds = array<i64: 4, 1, 128>}, {transform_indices = @transform_6, window_bounds = array<i64: 1, 1, 1>}]} {
    %0 = tpu.iota {dimensions = array<i32: 0>} : vector<128x256xi32>
    %cst = arith.constant 1.000000e+00 : f32
    %1 = vector.broadcast %cst : f32 to vector<1x256xf32>
    %cst_0 = arith.constant 0.000000e+00 : f32
    %c0_i32 = arith.constant 0 : i32
    %c4_i32 = arith.constant 4 : i32
    %2 = arith.addi %c0_i32, %c4_i32 : i32
    %c1_i32 = arith.constant 1 : i32
    %3 = scf.for %arg8 = %c0_i32 to %2 step %c1_i32 iter_args(%arg9 = %cst_0) -> (f32)  : i32 {
      %6 = arith.index_cast %arg8 : i32 to index
      %c0_4 = arith.constant 0 : index
      %c0_5 = arith.constant 0 : index
      %7 = vector.load %arg2[%6, %c0_4, %c0_5] : memref<4x128x4xf32, #tpu.memory_space<vmem>>, vector<1x128x4xf32>
      %8 = vector.shape_cast %7 : vector<1x128x4xf32> to vector<128x4xf32>
      %9 = arith.index_cast %arg8 : i32 to index
      %c0_6 = arith.constant 0 : index
      %c0_7 = arith.constant 0 : index
      %10 = vector.load %arg3[%9, %c0_6, %c0_7] : memref<4x4x128xf32, #tpu.memory_space<vmem>>, vector<1x4x128xf32>
      %11 = vector.shape_cast %10 : vector<1x4x128xf32> to vector<4x128xf32>
      %12 = arith.mulf %8, %8 : vector<128x4xf32>
      %cst_8 = arith.constant dense<0.000000e+00> : vector<128xf32>
      %13 = vector.multi_reduction <add>, %12, %cst_8 [1] : vector<128x4xf32> to vector<128xf32>
      %14 = vector.shape_cast %13 : vector<128xf32> to vector<128x1xf32>
      %cst_9 = arith.constant 0.000000e+00 : f32
      %15 = vector.broadcast %cst_9 : f32 to vector<4x128xf32>
      %cst_10 = arith.constant 0.000000e+00 : f32
      %16 = vector.broadcast %cst_10 : f32 to vector<1x128xf32>
      %cst_11 = arith.constant 0.000000e+00 : f32
      %c0_i32_12 = arith.constant 0 : i32
      %c2_i32 = arith.constant 2 : i32
      %17 = arith.addi %c0_i32_12, %c2_i32 : i32
      %c1_i32_13 = arith.constant 1 : i32
      %18:3 = scf.for %arg10 = %c0_i32_12 to %17 step %c1_i32_13 iter_args(%arg11 = %15, %arg12 = %16, %arg13 = %cst_11) -> (vector<4x128xf32>, vector<1x128xf32>, f32)  : i32 {
        %28 = arith.index_cast %arg10 : i32 to index
        %29 = arith.index_cast %arg8 : i32 to index
        %c0_19 = arith.constant 0 : index
        %c0_20 = arith.constant 0 : index
        %30 = vector.load %arg1[%28, %29, %c0_19, %c0_20] : memref<2x4x4x256xf32, #tpu.memory_space<vmem>>, vector<1x1x4x256xf32>
        %31 = vector.shape_cast %30 : vector<1x1x4x256xf32> to vector<4x256xf32>
        %32 = vector.extract_strided_slice %8 {offsets = [0, 0], sizes = [128, 1], strides = [1, 1]} : vector<128x4xf32> to vector<128x1xf32>
        %33 = vector.extract_strided_slice %31 {offsets = [0, 0], sizes = [1, 256], strides = [1, 1]} : vector<4x256xf32> to vector<1x256xf32>
        %34 = vector.broadcast %32 : vector<128x1xf32> to vector<128x256xf32>
        %35 = vector.broadcast %33 : vector<1x256xf32> to vector<128x256xf32>
        %36 = arith.mulf %34, %35 : vector<128x256xf32>
        %37 = vector.extract_strided_slice %8 {offsets = [0, 1], sizes = [128, 1], strides = [1, 1]} : vector<128x4xf32> to vector<128x1xf32>
        %38 = vector.extract_strided_slice %31 {offsets = [1, 0], sizes = [1, 256], strides = [1, 1]} : vector<4x256xf32> to vector<1x256xf32>
        %39 = vector.broadcast %37 : vector<128x1xf32> to vector<128x256xf32>
        %40 = vector.broadcast %38 : vector<1x256xf32> to vector<128x256xf32>
        %41 = arith.mulf %39, %40 : vector<128x256xf32>
        %42 = arith.addf %36, %41 : vector<128x256xf32>
        %43 = vector.extract_strided_slice %8 {offsets = [0, 2], sizes = [128, 1], strides = [1, 1]} : vector<128x4xf32> to vector<128x1xf32>
        %44 = vector.extract_strided_slice %31 {offsets = [2, 0], sizes = [1, 256], strides = [1, 1]} : vector<4x256xf32> to vector<1x256xf32>
        %45 = vector.broadcast %43 : vector<128x1xf32> to vector<128x256xf32>
        %46 = vector.broadcast %44 : vector<1x256xf32> to vector<128x256xf32>
        %47 = arith.mulf %45, %46 : vector<128x256xf32>
        %48 = arith.addf %42, %47 : vector<128x256xf32>
        %49 = vector.extract_strided_slice %8 {offsets = [0, 3], sizes = [128, 1], strides = [1, 1]} : vector<128x4xf32> to vector<128x1xf32>
        %50 = vector.extract_strided_slice %31 {offsets = [3, 0], sizes = [1, 256], strides = [1, 1]} : vector<4x256xf32> to vector<1x256xf32>
        %51 = vector.broadcast %49 : vector<128x1xf32> to vector<128x256xf32>
        %52 = vector.broadcast %50 : vector<1x256xf32> to vector<128x256xf32>
        %53 = arith.mulf %51, %52 : vector<128x256xf32>
        %54 = arith.addf %48, %53 : vector<128x256xf32>
        %cst_21 = arith.constant 2.000000e+00 : f32
        %55 = vector.broadcast %cst_21 : f32 to vector<128x256xf32>
        %56 = arith.mulf %55, %54 : vector<128x256xf32>
        %57 = vector.broadcast %14 : vector<128x1xf32> to vector<128x256xf32>
        %58 = arith.subf %57, %56 : vector<128x256xf32>
        %cst_22 = arith.constant dense<0x7F800000> : vector<256xf32>
        %59 = vector.multi_reduction <minimumf>, %58, %cst_22 [0] : vector<128x256xf32> to vector<256xf32>
        %60 = vector.shape_cast %59 : vector<256xf32> to vector<1x256xf32>
        %61 = vector.broadcast %60 : vector<1x256xf32> to vector<128x256xf32>
        %62 = arith.cmpf oeq, %58, %61 : vector<128x256xf32>
        %c128_i32 = arith.constant 128 : i32
        %63 = vector.broadcast %c128_i32 : i32 to vector<128x256xi32>
        %64 = arith.select %62, %0, %63 : vector<128x256xi1>, vector<128x256xi32>
        %cst_23 = arith.constant dense<2147483647> : vector<256xi32>
        %65 = vector.multi_reduction <minsi>, %64, %cst_23 [0] : vector<128x256xi32> to vector<256xi32>
        %66 = vector.shape_cast %65 : vector<256xi32> to vector<1x256xi32>
        %67 = vector.broadcast %66 : vector<1x256xi32> to vector<128x256xi32>
        %68 = arith.cmpi eq, %0, %67 : vector<128x256xi32>
        %69 = arith.extui %68 : vector<128x256xi1> to vector<128x256xi32>
        %70 = arith.sitofp %69 : vector<128x256xi32> to vector<128x256xf32>
        %cst_24 = arith.constant dense<0.000000e+00> : vector<4x256xf32>
        %71 = tpu.matmul %11, %70, %cst_24 {dimension_numbers = #tpu.dot_dimension_numbers<[1], [0], [0], [1], [0, 0, 1, 1], [], []>} : vector<4x128xf32>, vector<128x256xf32>, vector<4x256xf32> -> vector<4x256xf32>
        %72 = arith.index_cast %arg10 : i32 to index
        %73 = arith.index_cast %arg8 : i32 to index
        %c0_25 = arith.constant 0 : index
        %c0_26 = arith.constant 0 : index
        %74 = vector.load %arg4[%72, %73, %c0_25, %c0_26] : memref<2x4x4x256xf32, #tpu.memory_space<vmem>>, vector<1x1x4x256xf32>
        %75 = vector.shape_cast %74 : vector<1x1x4x256xf32> to vector<4x256xf32>
        %76 = vector.shape_cast %71 : vector<4x256xf32> to vector<1x1x4x256xf32>
        tpu.vector_store %arg4[%72, %73, %c0_25, %c0_26], %76 {strides = array<i32>} : memref<2x4x4x256xf32, #tpu.memory_space<vmem>>, vector<1x1x4x256xf32>,
        %cst_27 = arith.constant dense<0.000000e+00> : vector<4x128xf32>
        %77 = tpu.matmul %31, %70, %cst_27 {dimension_numbers = #tpu.dot_dimension_numbers<[1], [1], [0], [0], [0, 0, 1, 0], [], []>} : vector<4x256xf32>, vector<128x256xf32>, vector<4x128xf32> -> vector<4x128xf32>
        %78 = arith.addf %arg11, %77 : vector<4x128xf32>
        %cst_28 = arith.constant dense<0.000000e+00> : vector<1x128xf32>
        %79 = tpu.matmul %1, %70, %cst_28 {dimension_numbers = #tpu.dot_dimension_numbers<[1], [1], [0], [0], [0, 0, 1, 0], [], []>} : vector<1x256xf32>, vector<128x256xf32>, vector<1x128xf32> -> vector<1x128xf32>
        %80 = arith.addf %arg12, %79 : vector<1x128xf32>
        %81 = arith.subf %31, %71 : vector<4x256xf32>
        %82 = arith.mulf %81, %81 : vector<4x256xf32>
        %83 = vector.shape_cast %82 : vector<4x256xf32> to vector<1x4x256xf32>
        %cst_29 = arith.constant dense<0.000000e+00> : vector<1xf32>
        %84 = vector.multi_reduction <add>, %83, %cst_29 [1, 2] : vector<1x4x256xf32> to vector<1xf32>
        %85 = vector.shape_cast %84 : vector<1xf32> to vector<1x1x1xf32>
        %86 = vector.extract %85[0, 0, 0] : f32 from vector<1x1x1xf32>
        %87 = arith.addf %arg13, %86 : f32
        scf.yield %78, %80, %87 : vector<4x128xf32>, vector<1x128xf32>, f32
      }
      %c2_i32_14 = arith.constant 2 : i32
      %19 = arith.index_cast %arg8 : i32 to index
      %c0_15 = arith.constant 0 : index
      %c0_16 = arith.constant 0 : index
      %20 = vector.load %arg5[%19, %c0_15, %c0_16] : memref<4x4x128xf32, #tpu.memory_space<vmem>>, vector<1x4x128xf32>
      %21 = vector.shape_cast %20 : vector<1x4x128xf32> to vector<4x128xf32>
      %22 = vector.shape_cast %18#0 : vector<4x128xf32> to vector<1x4x128xf32>
      tpu.vector_store %arg5[%19, %c0_15, %c0_16], %22 {strides = array<i32>} : memref<4x4x128xf32, #tpu.memory_space<vmem>>, vector<1x4x128xf32>,
      %23 = arith.index_cast %arg8 : i32 to index
      %c0_17 = arith.constant 0 : index
      %c0_18 = arith.constant 0 : index
      %24 = vector.load %arg6[%23, %c0_17, %c0_18] : memref<4x1x128xf32, #tpu.memory_space<vmem>>, vector<1x1x128xf32>
      %25 = vector.shape_cast %24 : vector<1x1x128xf32> to vector<1x128xf32>
      %26 = vector.shape_cast %18#1 : vector<1x128xf32> to vector<1x1x128xf32>
      tpu.vector_store %arg6[%23, %c0_17, %c0_18], %26 {strides = array<i32>} : memref<4x1x128xf32, #tpu.memory_space<vmem>>, vector<1x1x128xf32>,
      %27 = arith.addf %arg9, %18#2 : f32
      scf.yield %27 : f32
    }
    %c4_i32_1 = arith.constant 4 : i32
    %4 = vector.broadcast %3 : f32 to vector<1x1x1xf32>
    %c0 = arith.constant 0 : index
    %c0_2 = arith.constant 0 : index
    %c0_3 = arith.constant 0 : index
    %5 = vector.load %arg7[%c0, %c0_2, %c0_3] : memref<1x1x1xf32, #tpu.memory_space<vmem>>, vector<1x1x1xf32>
    tpu.vector_store %arg7[%c0, %c0_2, %c0_3], %4 {strides = array<i32>} : memref<1x1x1xf32, #tpu.memory_space<vmem>>, vector<1x1x1xf32>,
    return
  }
  func.func @transform_0(%arg0: i32) -> (i32, i32, i32, i32) {
    %c0_i32 = arith.constant 0 : i32
    %c0_i32_0 = arith.constant 0 : i32
    %c0_i32_1 = arith.constant 0 : i32
    %c0_i32_2 = arith.constant 0 : i32
    return %c0_i32, %arg0, %c0_i32_0, %c0_i32_1 : i32, i32, i32, i32
  }
  func.func @transform_1(%arg0: i32) -> (i32, i32, i32) {
    %c0_i32 = arith.constant 0 : i32
    %c0_i32_0 = arith.constant 0 : i32
    %c0_i32_1 = arith.constant 0 : i32
    return %arg0, %c0_i32, %c0_i32_0 : i32, i32, i32
  }
  func.func @transform_2(%arg0: i32) -> (i32, i32, i32) {
    %c0_i32 = arith.constant 0 : i32
    %c0_i32_0 = arith.constant 0 : i32
    %c0_i32_1 = arith.constant 0 : i32
    return %arg0, %c0_i32, %c0_i32_0 : i32, i32, i32
  }
  func.func @transform_3(%arg0: i32) -> (i32, i32, i32, i32) {
    %c0_i32 = arith.constant 0 : i32
    %c0_i32_0 = arith.constant 0 : i32
    %c0_i32_1 = arith.constant 0 : i32
    %c0_i32_2 = arith.constant 0 : i32
    return %c0_i32, %arg0, %c0_i32_0, %c0_i32_1 : i32, i32, i32, i32
  }
  func.func @transform_4(%arg0: i32) -> (i32, i32, i32) {
    %c0_i32 = arith.constant 0 : i32
    %c0_i32_0 = arith.constant 0 : i32
    %c0_i32_1 = arith.constant 0 : i32
    return %arg0, %c0_i32, %c0_i32_0 : i32, i32, i32
  }
  func.func @transform_5(%arg0: i32) -> (i32, i32, i32) {
    %c0_i32 = arith.constant 0 : i32
    %c0_i32_0 = arith.constant 0 : i32
    %c0_i32_1 = arith.constant 0 : i32
    return %arg0, %c0_i32, %c0_i32_0 : i32, i32, i32
  }
  func.func @transform_6(%arg0: i32) -> (i32, i32, i32) {
    %c0_i32 = arith.constant 0 : i32
    %c0_i32_0 = arith.constant 0 : i32
    %c0_i32_1 = arith.constant 0 : i32
    return %arg0, %c0_i32, %c0_i32_0 : i32, i32, i32
  }
}

</mosaic_0001>

<bundles_post_ra>
// kernel: _lambda_.1
= control target key start
LH: loop header
LB: loop body
LE: loop exit
PB: predicated region body
PF: predicated region fallthrough
CT: control target
= control target key end

     0   :  { %s2444_s21 = smov 0   ;;  %s2446_s22 = smov 0   ;;  %s3821_s0 = inlined_call_operand.vmem [shape: f32[2,8,4,256], index: 0, kind: input, shape index: {}]   ;;  %s3822_s1 = inlined_call_operand.vmem [shape: f32[8,128,4], index: 1, kind: input, shape index: {}]   ;;  %s3823_s2 = inlined_call_operand.vmem [shape: f32[8,4,128], index: 2, kind: input, shape index: {}]   ;;  %s3824_s3 = inlined_call_operand.vmem [shape: f32[2,8,4,256], index: 3, kind: output, shape index: {0}]   ;;  %s3825_s4 = inlined_call_operand.vmem [shape: f32[8,4,128], index: 4, kind: output, shape index: {1}]   ;;  %s3826_s5 = inlined_call_operand.vmem [shape: f32[8,1,128], index: 5, kind: output, shape index: {2}]   ;;  %s3827_s6 = inlined_call_operand.vmem [shape: f32[2,1,1], index: 6, kind: output, shape index: {3}]  }
   0x1   :  { %s2448_s23 = smov 0  }
   0x2 LB: > { %s2460_s24 = sadd.s32 4294967295, %s2376_s23   ;;  %s2463_s25 = sadd.s32 1, %s2376_s23   ;;  %s2376_s23 = sphi %s2448_s23, %s4107_s23   ;;  %s2372_s22 = sphi %s2446_s22, %s4106_s22   ;;  %s2368_s21 = sphi %s2444_s21, %s4105_s21  }
   0x3   : > { %s21_s26 = ssub.s32 %s2376_s23, %s2463_s25  ;;  %s24_s27 = sadd.s32 1, %s2372_s22 }
   0x4   : > { %p22_p0 = scmp.eq.s32.totalorder %s21_s26, 0  ;;  %p31_p1 = scmp.ne.s32.totalorder %s2372_s22, %s2368_s21 }
   0x5   : > { %p32_p2 = scmp.eq.s32.totalorder %s2376_s23, 0  ;;  %p113_p3 = scmp.eq.s32.totalorder %s2460_s24, 1 }
   0x6   : > { %s2473_s28 = scalar_select %p22_p0, %s2372_s22, %s24_s27  }
   0x7   : > { %p33_p4 = por %p32_p2, %p31_p1  ;;  %p2475_p5 = por %p113_p3, %p31_p1 }
   0x8   : > { %p1959_p6 = scmp.ge.s32.totalorder %s2376_s23, 2 }
   0xa   : > { %213 = sbr.rel (%p1959_p6) target bundleno = 25 (0x19), region = 16 }
  0x11   : > { %216 = sbr.rel (!%p33_p4) target bundleno = 25 (0x19), region = 20  ;;  %s218_s30 = sand.u32 (%p33_p4), 1, %s2372_s22  }
  0x12   : > { %s2116_s7 = sshll.u32 (%p33_p4), %s2376_s23, 5  ;;  %s1960_s8 = sshll.u32 (%p33_p4), %s218_s30, 6 }
  0x13   : > { %s224_s11 = scalar_lea.vmem (%p33_p4), %s3821_s0, %s2116_s7  ;;  %s220_s12 = scalar_lea.vmem (%p33_p4), [#allocation2], %s1960_s8 }
  0x14   : > { %v266_v0 = vld [vmem:[%s224_s11] sm:$0xff] (%p33_p4)  ;;  %v268_v1 = vld [vmem:[%s224_s11 + $0x8] sm:$0xff] (%p33_p4)  ;;  %v270_v2 = vld [vmem:[%s224_s11 + $0x10] sm:$0xff] (%p33_p4) }
  0x15   : > { %267 = vst [vmem:[%s220_s12] sm:$0xff] (%p33_p4), %v266_v0  ;;  %269 = vst [vmem:[%s220_s12 + $0x8] sm:$0xff] (%p33_p4), %v268_v1  ;;  %v272_v3 = vld [vmem:[%s224_s11 + $0x18] sm:$0xff] (%p33_p4)  ;;  %v274_v4 = vld [vmem:[%s224_s11 + $0x40] sm:$0xff] (%p33_p4) }
  0x16   : > { %271 = vst [vmem:[%s220_s12 + $0x10] sm:$0xff] (%p33_p4), %v270_v2  ;;  %v276_v5 = vld [vmem:[%s224_s11 + $0x48] sm:$0xff] (%p33_p4)  ;;  %273 = vst [vmem:[%s220_s12 + $0x18] sm:$0xff] (%p33_p4), %v272_v3  ;;  %v278_v6 = vld [vmem:[%s224_s11 + $0x50] sm:$0xff] (%p33_p4) }
  0x17   : > { %275 = vst [vmem:[%s220_s12 + $0x20] sm:$0xff] (%p33_p4), %v274_v4  ;;  %277 = vst [vmem:[%s220_s12 + $0x28] sm:$0xff] (%p33_p4), %v276_v5  ;;  %v280_v7 = vld [vmem:[%s224_s11 + $0x58] sm:$0xff] (%p33_p4) }
  0x18   : > { %279 = vst [vmem:[%s220_s12 + $0x30] sm:$0xff] %v278_v6  ;;  %281 = vst [vmem:[%s220_s12 + $0x38] sm:$0xff] %v280_v7 }
  0x19 PF: > { %p1964_p7 = scmp.ge.s32.totalorder %s2376_s23, 1  ;;  %p305_p8 = scmp.lt.s32.totalorder %s2376_s23, 3 }
  0x1b   : > { %p306_p9 = pnand %p1964_p7, %p305_p8 }
  0x1d   : > { %309 = sbr.rel (%p306_p9) target bundleno = 1100 (0x44c), region = 66 }
  0x24   : > { %s312_s13 = sand.u32 1, %s2368_s21   ;;  %s1967_s14 = sshll.u32 %s2460_s24, 2  ;;  %v392_v8 = vlaneseq }
  0x25   : > { %s2489_s15 = sshll.u32 %s312_s13, 6  ;;  %p365_p10 = scmp.lt.s32.totalorder %s1967_s14, 7 }
  0x26   : > { %v2491_v9 = vshrl.u32 %v392_v8, 7  ;;  %p389_p11 = scmp.lt.s32.totalorder %s2460_s24, 1  ;;  %s2573_s18 = scalar_lea.vmem [#allocation3], %s2489_s15 }
  0x27   : > { %s4109_s14 = smov (!%p365_p10, %s1967_s14), 7  ;;  %s2575_s19 = smov 0.0  }
  0x28   : > { %3924 = vst [vmem:[#allocation4_spill] sm:$0xff] %v2491_v9  ;;  %v2497_v10 = vadd.s32 8, %v2491_v9  ;;  %v2500_v11 = vadd.s32 16, %v2491_v9  ;;  %v2503_v12 = vadd.s32 24, %v2491_v9  ;;  %v2506_v13 = vadd.s32 32, %v2491_v9  ;;  %s2117_s16 = sshll.u32 %s4109_s14, 7  ;;  %s387_s10 = scalar_lea.vmem %s3826_s5, %s4109_s14 }
  0x29   : > { %s1971_s17 = sshll.u32 %s4109_s14, 2  ;;  %v2511_v14 = vadd.s32 40, %v2491_v9  ;;  %v2514_v15 = vadd.s32 48, %v2491_v9  ;;  %v2517_v16 = vadd.s32 56, %v2491_v9  ;;  %v2520_v17 = vadd.s32 64, %v2491_v9  ;;  %s2525_s20 = scalar_lea.vmem %s3822_s1, %s2117_s16 }
  0x2a   : > { %3925 = vst [vmem:[#allocation5_spill] sm:$0xff] %v2497_v10  ;;  %3926 = vst [vmem:[#allocation6_spill] sm:$0xff] %v2500_v11  ;;  %s2530_s26 = scalar_lea.vmem %s3823_s2, %s1971_s17  ;;  %v2533_v18 = vadd.s32 72, %v2491_v9  ;;  %v2536_v19 = vadd.s32 80, %v2491_v9  ;;  %v2539_v20 = vadd.s32 88, %v2491_v9  ;;  %v2542_v21 = vadd.s32 96, %v2491_v9  ;;  %s2547_s7 = scalar_lea.vmem %s3825_s4, %s1971_s17 }
  0x2b   : > { %3927 = vst [vmem:[#allocation7_spill] sm:$0xff] %v2503_v12  ;;  %3928 = vst [vmem:[#allocation8_spill] sm:$0xff] %v2506_v13  ;;  %v2554_v22 = vadd.s32 104, %v2491_v9  ;;  %v2557_v23 = vadd.s32 112, %v2491_v9  ;;  %v2560_v24 = vadd.s32 120, %v2491_v9  ;;  %s2565_s11 = scalar_select %p389_p11, %s2460_s24, 1 }
  0x2c   : > { %3929 = vst [vmem:[#allocation9_spill] sm:$0xff] %v2511_v14  ;;  %3930 = vst [vmem:[#allocation10_spill] sm:$0xff] %v2514_v15  ;;  %s2577_s21 = smov 0  }
  0x2d   : > { %3931 = vst [vmem:[#allocation11_spill] sm:$0xff] %v2517_v16  ;;  %3932 = vst [vmem:[#allocation12_spill] sm:$0xff] %v2520_v17 }
  0x2e   : > { %3933 = vst [vmem:[#allocation13_spill] sm:$0xff] %v2533_v18  ;;  %3934 = vst [vmem:[#allocation14_spill] sm:$0xff] %v2536_v19 }
  0x2f   : > { %3935 = vst [vmem:[#allocation15_spill] sm:$0xff] %v2539_v20  ;;  %3936 = vst [vmem:[#allocation16_spill] sm:$0xff] %v2542_v21 }
  0x30   : > { %3937 = vst [vmem:[#allocation17_spill] sm:$0xff] %v2554_v22  ;;  %3938 = vst [vmem:[#allocation18_spill] sm:$0xff] %v2557_v23 }
  0x31   : > { %3939 = vst [vmem:[#allocation19_spill] sm:$0xff] %v2560_v24 }
  0x32 LB: >> { %s1975_s23 = sshll.u32 %s2384_s21, 7  ;;  %s1976_s27 = sshll.u32 %s2384_s21, 2  ;;  %vm453_vm0 = vcmask 31744   ;;  %s2384_s21 = sphi %s2577_s21, %s414_s21   ;;  %s2380_s19 = sphi %s2575_s19, %s4103_s19  }
  0x33   : >> { %s2588_s30 = scalar_lea.vmem %s2525_s20, %s1975_s23  ;;  %s435_s8 = scalar_lea.vmem %s2530_s26, %s1976_s27 }
  0x34   : >> { %v2594_v25 = vld [vmem:[%s2588_s30 + $0x10] sm:$0xff]  ;;  %v2596_v26 = vld [vmem:[%s435_s8] sm:$0xf]  ;;  %v2606_v30 = vld [vmem:[%s2588_s30 + $0x18] sm:$0xff]  ;;  %s2723_s9 = smov 0.0   ;;  %s2729_s12 = smov 0  }
  0x35   : >> { %3940 = vst [vmem:[#allocation20_spill] sm:$0xff] %v2594_v25  ;;  %3941 = vst [vmem:[#allocation21_spill] sm:$0xff] %v2596_v26  ;;  %v2599_v27 = vld [vmem:[%s2588_s30] sm:$0xff]  ;;  %v439_v28 = vmul.f32 %v2594_v25, %v2594_v25  ;;  %v2609_v31 = vld [vmem:[%s2588_s30 + $0x8] sm:$0xff]  ;;  %v440_v32 = vmul.f32 %v2606_v30, %v2606_v30 }
  0x36   : >> { %3942 = vst [vmem:[#allocation22_spill] sm:$0xff] %v2599_v27  ;;  %v437_v29 = vmul.f32 %v2599_v27, %v2599_v27  ;;  %3943 = vst [vmem:[#allocation23_spill] sm:$0xff] %v2606_v30  ;;  %v438_v33 = vmul.f32 %v2609_v31, %v2609_v31  ;;  %v2616_v34 = vld [vmem:[%s2588_s30 + $0x28] sm:$0xff]  ;;  %v2619_v35 = vld [vmem:[%s2588_s30 + $0x20] sm:$0xff] }
  0x37   : >> { %3944 = vst [vmem:[#allocation24_spill] sm:$0xff] %v2609_v31  ;;  %3945 = vst [vmem:[#allocation25_spill] sm:$0xff] %v2616_v34  ;;  %v460_v36 = vsel %vm453_vm0, %v439_v28, 0.0  ;;  %v463_v38 = vsel %vm453_vm0, %v440_v32, 0.0  ;;  %v442_v40 = vmul.f32 %v2616_v34, %v2616_v34  ;;  %v441_v41 = vmul.f32 %v2619_v35, %v2619_v35  ;;  %v2630_v42 = vld [vmem:[%s2588_s30 + $0x38] sm:$0xff]  ;;  %v2633_v43 = vld [vmem:[%s2588_s30 + $0x30] sm:$0xff] }
  0x38   : >> { %3946 = vst [vmem:[#allocation26_spill] sm:$0xff] %v2619_v35  ;;  %v454_v37 = vsel %vm453_vm0, %v437_v29, 0.0  ;;  %461 = vadd.xlane.f32.xlu1 %v460_v36  ;;  %v457_v39 = vsel %vm453_vm0, %v438_v33, 0.0  ;;  %3947 = vst [vmem:[#allocation27_spill] sm:$0xff] %v2630_v42  ;;  %v444_v46 = vmul.f32 %v2630_v42, %v2630_v42  ;;  %v443_v47 = vmul.f32 %v2633_v43, %v2633_v43  ;;  %v2642_v48 = vld [vmem:[%s2588_s30 + $0x48] sm:$0xff]  ;;  %v2645_v49 = vld [vmem:[%s2588_s30 + $0x40] sm:$0xff] }
  0x39   : >> { %455 = vadd.xlane.f32.xlu0 %v454_v37  ;;  %3948 = vst [vmem:[#allocation28_spill] sm:$0xff] %v2633_v43  ;;  %v469_v44 = vsel %vm453_vm0, %v442_v40, 0.0  ;;  %v466_v45 = vsel %vm453_vm0, %v441_v41, 0.0  ;;  %3949 = vst [vmem:[#allocation29_spill] sm:$0xff] %v2642_v48  ;;  %v446_v52 = vmul.f32 %v2642_v48, %v2642_v48  ;;  %v445_v53 = vmul.f32 %v2645_v49, %v2645_v49  ;;  %v2654_v54 = vld [vmem:[%s2588_s30 + $0x58] sm:$0xff]  ;;  %v2657_v55 = vld [vmem:[%s2588_s30 + $0x50] sm:$0xff] }
  0x3a   : >> { %3950 = vst [vmem:[#allocation30_spill] sm:$0xff] %v2645_v49  ;;  %v475_v50 = vsel %vm453_vm0, %v444_v46, 0.0  ;;  %v472_v51 = vsel %vm453_vm0, %v443_v47, 0.0  ;;  %3951 = vst [vmem:[#allocation31_spill] sm:$0xff] %v2654_v54  ;;  %v448_v58 = vmul.f32 %v2654_v54, %v2654_v54  ;;  %v447_v59 = vmul.f32 %v2657_v55, %v2657_v55  ;;  %v2666_v60 = vld [vmem:[%s2588_s30 + $0x68] sm:$0xff]  ;;  %v2669_v61 = vld [vmem:[%s2588_s30 + $0x60] sm:$0xff] }
  0x3b   : >> { %3952 = vst [vmem:[#allocation32_spill] sm:$0xff] %v2657_v55  ;;  %v481_v56 = vsel %vm453_vm0, %v446_v52, 0.0  ;;  %v478_v57 = vsel %vm453_vm0, %v445_v53, 0.0  ;;  %3953 = vst [vmem:[#allocation33_spill] sm:$0xff] %v2666_v60  ;;  %v450_v0 = vmul.f32 %v2666_v60, %v2666_v60  ;;  %v449_v1 = vmul.f32 %v2669_v61, %v2669_v61  ;;  %v2678_v2 = vld [vmem:[%s2588_s30 + $0x78] sm:$0xff]  ;;  %v2681_v3 = vld [vmem:[%s2588_s30 + $0x70] sm:$0xff] }
  0x3c   : >> { %464 = vadd.xlane.f32.xlu1 %v463_v38  ;;  %3954 = vst [vmem:[#allocation34_spill] sm:$0xff] %v2669_v61  ;;  %v487_v62 = vsel %vm453_vm0, %v448_v58, 0.0  ;;  %v484_v63 = vsel %vm453_vm0, %v447_v59, 0.0  ;;  %3955 = vst [vmem:[#allocation35_spill] sm:$0xff] %v2678_v2  ;;  %v452_v6 = vmul.f32 %v2678_v2, %v2678_v2  ;;  %v451_v7 = vmul.f32 %v2681_v3, %v2681_v3 }
  0x3d   : >> { %458 = vadd.xlane.f32.xlu0 %v457_v39  ;;  %3956 = vst [vmem:[#allocation36_spill] sm:$0xff] %v2681_v3  ;;  %v493_v4 = vsel %vm453_vm0, %v450_v0, 0.0  ;;  %v490_v5 = vsel %vm453_vm0, %v449_v1, 0.0  ;;  %v2725_v53 = vmov 0.0  }
  0x3e   : >> { %v499_v8 = vsel %vm453_vm0, %v452_v6, 0.0  ;;  %v496_v28 = vsel %vm453_vm0, %v451_v7, 0.0 }
  0x40   : >> { %470 = vadd.xlane.f32.xlu1 %v469_v44 }
  0x41   : >> { %467 = vadd.xlane.f32.xlu0 %v466_v45 }
  0x44   : >> { %476 = vadd.xlane.f32.xlu1 %v475_v50 }
  0x45   : >> { %473 = vadd.xlane.f32.xlu0 %v472_v51 }
  0x48   : >> { %482 = vadd.xlane.f32.xlu1 %v481_v56  ;;  %v2727_v56 = vmov 0.0  }
  0x49   : >> { %479 = vadd.xlane.f32.xlu0 %v478_v57 }
  0x4c   : >> { %488 = vadd.xlane.f32.xlu1 %v487_v62 }
  0x4d   : >> { %485 = vadd.xlane.f32.xlu0 %v484_v63 }
  0x50   : >> { %494 = vadd.xlane.f32.xlu1 %v493_v4 }
  0x51   : >> { %491 = vadd.xlane.f32.xlu0 %v490_v5 }
  0x54   : >> { %500 = vadd.xlane.f32.xlu1 %v499_v8 }
  0x55   : >> { %497 = vadd.xlane.f32.xlu0 %v496_v28 }
  0xc5   : >> { %v2691_v29 = vpop.xlane.xlu1 %461 }
  0xc6   : >> { %3957 = vst [vmem:[#allocation37_spill] sm:$0xff] %v2691_v29  ;;  %v2693_v32 = vpop.xlane.xlu0 %455 }
  0xc7   : >> { %3958 = vst [vmem:[#allocation38_spill] sm:$0xff] %v2693_v32 }
  0xc9   : >> { %v2695_v33 = vpop.xlane.xlu1 %464 }
  0xca   : >> { %3959 = vst [vmem:[#allocation39_spill] sm:$0xff] %v2695_v33  ;;  %v2697_v36 = vpop.xlane.xlu0 %458 }
  0xcb   : >> { %3960 = vst [vmem:[#allocation40_spill] sm:$0xff] %v2697_v36 }
  0xcd   : >> { %v2699_v37 = vpop.xlane.xlu1 %470 }
  0xce   : >> { %3961 = vst [vmem:[#allocation41_spill] sm:$0xff] %v2699_v37  ;;  %v2701_v38 = vpop.xlane.xlu0 %467 }
  0xcf   : >> { %3962 = vst [vmem:[#allocation42_spill] sm:$0xff] %v2701_v38 }
  0xd1   : >> { %v2703_v39 = vpop.xlane.xlu1 %476 }
  0xd2   : >> { %3963 = vst [vmem:[#allocation43_spill] sm:$0xff] %v2703_v39  ;;  %v2705_v40 = vpop.xlane.xlu0 %473 }
  0xd3   : >> { %3964 = vst [vmem:[#allocation44_spill] sm:$0xff] %v2705_v40 }
  0xd5   : >> { %v2707_v41 = vpop.xlane.xlu1 %482 }
  0xd6   : >> { %v2709_v44 = vpop.xlane.xlu0 %479 }
  0xd9   : >> { %v2711_v45 = vpop.xlane.xlu1 %488 }
  0xda   : >> { %3965 = vst [vmem:[#allocation45_spill] sm:$0xff] %v2711_v45  ;;  %v2713_v46 = vpop.xlane.xlu0 %485 }
  0xdd   : >> { %v2715_v47 = vpop.xlane.xlu1 %494 }
  0xde   : >> { %3966 = vst [vmem:[#allocation46_spill] sm:$0xff] %v2715_v47  ;;  %v2717_v50 = vpop.xlane.xlu0 %491 }
  0xdf   : >> { %3967 = vst [vmem:[#allocation47_spill] sm:$0xff] %v2717_v50 }
  0xe1   : >> { %v2719_v51 = vpop.xlane.xlu1 %500 }
  0xe2   : >> { %3968 = vst [vmem:[#allocation48_spill] sm:$0xff] %v2719_v51  ;;  %v2721_v52 = vpop.xlane.xlu0 %497 }
  0xe3   : >> { %3969 = vst [vmem:[#allocation49_spill] sm:$0xff] %v2721_v52 }
  0xe4 LB: >>> { %v3970_v40 = vld [vmem:[#allocation44_spill] sm:$0xff]  ;;  %v3971_v39 = vld [vmem:[#allocation43_spill] sm:$0xff]  ;;  %v3972_v38 = vld [vmem:[#allocation42_spill] sm:$0xff]  ;;  %3995 = vst [vmem:[#allocation50_spill] sm:$0xff] %v2392_v53  ;;  %v3828_v57 = vmov 0   ;;  %v3843_v58 = vmov 1   ;;  %s2388_s9 = sphi %s2723_s9, %s4100_s9   ;;  %s2400_s12 = sphi %s2729_s12, %s507_s12   ;;  %v2396_v56 = vphi %v2727_v56, %v4102_v56   ;;  %v2392_v53 = vphi %v2725_v53, %v4101_v53  }
  0xe5   : >>> { %v3973_v37 = vld [vmem:[#allocation41_spill] sm:$0xff]  ;;  %v3974_v36 = vld [vmem:[#allocation40_spill] sm:$0xff]  ;;  %v3975_v33 = vld [vmem:[#allocation39_spill] sm:$0xff]  ;;  %3996 = vst [vmem:[#allocation51_spill] sm:$0xff] %v2396_v56  ;;  %2298 = vset.pattern.permute.xlu1 %v3828_v57  ;;  %2297 = vset.pattern.permute.xlu0 %v3828_v57  ;;  %v3831_v59 = vmov 2   ;;  %v3829_v62 = vmov 3  }
  0xe6   : >>> { %v3976_v32 = vld [vmem:[#allocation38_spill] sm:$0xff]  ;;  %v3977_v29 = vld [vmem:[#allocation37_spill] sm:$0xff]  ;;  %v3979_v2 = vld [vmem:[#allocation35_spill] sm:$0xff]  ;;  %s1977_s13 = sshll.u32 %s2384_s21, 1  ;;  %s1978_s23 = sshll.u32 %s2400_s12, 3  ;;  %v4001_v19 = vmov 1  }
  0xe7   : >>> { %v3978_v60 = vld [vmem:[#allocation33_spill] sm:$0xff]  ;;  %v3980_v61 = vld [vmem:[#allocation34_spill] sm:$0xff]  ;;  %v3981_v9 = vld [vmem:[#allocation4_spill] sm:$0xff]  ;;  %s2815_s30 = sadd.s32 %s1978_s23, %s1977_s13  ;;  %s3997_s17 = scalar_lea.vmem [#allocation2], %s2489_s15 }
  0xe8   : >>> { %v3982_v54 = vld [vmem:[#allocation31_spill] sm:$0xff]  ;;  %v3983_v3 = vld [vmem:[#allocation36_spill] sm:$0xff]  ;;  %v3984_v48 = vld [vmem:[#allocation29_spill] sm:$0xff]  ;;  %s1979_s8 = sshll.u32 %s2815_s30, 2  ;;  %v600_v63 = vsub.s32 0, %v3981_v9  ;;  %v604_v0 = vsub.s32 4, %v3981_v9 }
  0xe9   : >>> { %v3985_v49 = vld [vmem:[#allocation30_spill] sm:$0xff]  ;;  %v3986_v55 = vld [vmem:[#allocation32_spill] sm:$0xff]  ;;  %v3988_v42 = vld [vmem:[#allocation27_spill] sm:$0xff]  ;;  %s2824_s16 = scalar_lea.vmem %s3997_s17, %s1979_s8 [#allocation2]  ;;  %v714_v1 = vsub.s32 1, %v3981_v9  ;;  %v718_v4 = vsub.s32 5, %v3981_v9  ;;  %s1506_s13 = scalar_lea.vmem %s2573_s18, %s1979_s8 [#allocation3] }
  0xea   : >>> { %v3987_v43 = vld [vmem:[#allocation28_spill] sm:$0xff]  ;;  %v3989_v35 = vld [vmem:[#allocation26_spill] sm:$0xff]  ;;  %v3990_v34 = vld [vmem:[#allocation25_spill] sm:$0xff]  ;;  %s507_s12 = sadd.s32 1, %s2400_s12  }
  0xeb   : >>> { %v3991_v31 = vld [vmem:[#allocation24_spill] sm:$0xff]  ;;  %v3992_v30 = vld [vmem:[#allocation23_spill] sm:$0xff]  ;;  %v3993_v27 = vld [vmem:[#allocation22_spill] sm:$0xff]  ;;  %p504_p12 = scmp.ge.s32.totalorder %s507_s12, 2  }
  0xec   : >>> { %v3994_v25 = vld [vmem:[#allocation20_spill] sm:$0xff]  ;;  %519 = vperm.xlu0 %2297, %v3993_v27   ;;  %s1671_s30 = scalar_lea.vmem (%p504_p12), %s2547_s7, %s1976_s27 }
  0xed   : >>> { %529 = vperm.xlu1 %2298, %v3994_v25   ;;  %v2832_v5 = vld [vmem:[%s2824_s16] sm:$0xff] }
  0xee   : >>> { %v601_v8 = vrot.slane %v2832_v5, %v600_v63  ;;  %v605_v28 = vrot.slane %v2832_v5, %v604_v0  ;;  %v3998_v0 = vmov 2  }
  0xf0   : >>> { %524 = vperm.xlu0 %2297, %v3991_v31  }
  0xf1   : >>> { %534 = vperm.xlu1 %2298, %v3992_v30  }
  0xf4   : >>> { %544 = vperm.xlu0 %2297, %v3990_v34  }
  0xf5   : >>> { %2299 = vset.pattern.permute.xlu1 %v3843_v58 }
  0xf6   : >>> { %653 = vperm.xlu1 %2299, %v3991_v31  }
  0xf8   : >>> { %554 = vperm.xlu0 %2297, %v3988_v42  }
  0xfa   : >>> { %657 = vperm.xlu1 %2299, %v3994_v25  }
  0xfc   : >>> { %559 = vperm.xlu0 %2297, %v3985_v49  }
  0xfe   : >>> { %2300 = vset.pattern.permute.xlu1 %v3828_v57 }
  0xff   : >>> { %539 = vperm.xlu1 %2300, %v3989_v35  }
 0x100   : >>> { %574 = vperm.xlu0 %2297, %v3982_v54  }
 0x103   : >>> { %2301 = vset.pattern.permute.xlu1 %v3843_v58 }
 0x104   : >>> { %665 = vperm.xlu1 %2301, %v3989_v35   ;;  %589 = vperm.xlu0 %2297, %v3983_v3  }
 0x108   : >>> { %669 = vperm.xlu1 %2301, %v3990_v34   ;;  %2319 = vset.pattern.permute.xlu0 %v3843_v58 }
 0x109   : >>> { %649 = vperm.xlu0 %2319, %v3993_v27  }
 0x10c   : >>> { %2302 = vset.pattern.permute.xlu1 %v3831_v59 }
 0x10d   : >>> { %799 = vperm.xlu1 %2302, %v3991_v31   ;;  %661 = vperm.xlu0 %2319, %v3992_v30  }
 0x111   : >>> { %803 = vperm.xlu1 %2302, %v3994_v25   ;;  %685 = vperm.xlu0 %2319, %v3984_v48  }
 0x115   : >>> { %2303 = vset.pattern.permute.xlu1 %v3828_v57  ;;  %697 = vperm.xlu0 %2319, %v3980_v61  }
 0x116   : >>> { %549 = vperm.xlu1 %2303, %v3987_v43  }
 0x119   : >>> { %709 = vperm.xlu0 %2319, %v3979_v2  }
 0x11a   : >>> { %2304 = vset.pattern.permute.xlu1 %v3843_v58 }
 0x11b   : >>> { %673 = vperm.xlu1 %2304, %v3987_v43  }
 0x11d   : >>> { %2322 = vset.pattern.permute.xlu0 %v3831_v59 }
 0x11e   : >>> { %795 = vperm.xlu0 %2322, %v3993_v27  }
 0x11f   : >>> { %677 = vperm.xlu1 %2304, %v3988_v42  }
 0x122   : >>> { %807 = vperm.xlu0 %2322, %v3992_v30  }
 0x123   : >>> { %2305 = vset.pattern.permute.xlu1 %v3831_v59 }
 0x124   : >>> { %815 = vperm.xlu1 %2305, %v3990_v34  }
 0x126   : >>> { %811 = vperm.xlu0 %2322, %v3989_v35  }
 0x128   : >>> { %2306 = vset.pattern.permute.xlu1 %v3829_v62 }
 0x129   : >>> { %941 = vperm.xlu1 %2306, %v3993_v27   ;;  %v2844_v27 = vrot.slane %v601_v8, %v600_v63 }
 0x12a   : >>> { %827 = vperm.xlu0 %2322, %v3985_v49  }
 0x12d   : >>> { %949 = vperm.xlu1 %2306, %v3994_v25  }
 0x12e   : >>> { %839 = vperm.xlu0 %2322, %v3982_v54  }
 0x131   : >>> { %953 = vperm.xlu1 %2306, %v3992_v30   ;;  %v2846_v30 = vrot.slane %v605_v28, %v600_v63 }
 0x132   : >>> { %855 = vperm.xlu0 %2322, %v3979_v2  }
 0x135   : >>> { %2307 = vset.pattern.permute.xlu1 %v3828_v57 }
 0x136   : >>> { %564 = vperm.xlu1 %2307, %v3984_v48   ;;  %2326 = vset.pattern.permute.xlu0 %v3829_v62 }
 0x137   : >>> { %945 = vperm.xlu0 %2326, %v3991_v31  }
 0x13a   : >>> { %2308 = vset.pattern.permute.xlu1 %v3843_v58 }
 0x13b   : >>> { %681 = vperm.xlu1 %2308, %v3985_v49   ;;  %957 = vperm.xlu0 %2326, %v3989_v35  }
 0x13f   : >>> { %2309 = vset.pattern.permute.xlu1 %v3831_v59  ;;  %969 = vperm.xlu0 %2326, %v3988_v42  }
 0x140   : >>> { %819 = vperm.xlu1 %2309, %v3987_v43  }
 0x143   : >>> { %981 = vperm.xlu0 %2326, %v3986_v55  }
 0x144   : >>> { %823 = vperm.xlu1 %2309, %v3988_v42  }
 0x147   : >>> { %997 = vperm.xlu0 %2326, %v3983_v3  }
 0x148   : >>> { %2310 = vset.pattern.permute.xlu1 %v3829_v62 }
 0x149   : >>> { %961 = vperm.xlu1 %2310, %v3990_v34  }
 0x14d   : >>> { %2311 = vset.pattern.permute.xlu1 %v3828_v57 }
 0x14e   : >>> { %569 = vperm.xlu1 %2311, %v3986_v55  }
 0x152   : >>> { %2312 = vset.pattern.permute.xlu1 %v3843_v58 }
 0x153   : >>> { %689 = vperm.xlu1 %2312, %v3986_v55  }
 0x157   : >>> { %693 = vperm.xlu1 %2312, %v3982_v54  }
 0x15b   : >>> { %2313 = vset.pattern.permute.xlu1 %v3831_v59 }
 0x15c   : >>> { %831 = vperm.xlu1 %2313, %v3984_v48  }
 0x160   : >>> { %2314 = vset.pattern.permute.xlu1 %v3829_v62  ;;  %v719_v62 = vrot.slane %v2832_v5, %v718_v4 }
 0x161   : >>> { %965 = vperm.xlu1 %2314, %v3987_v43  }
 0x162   : >>> { %v2850_v34 = vrot.slane %v719_v62, %v714_v1 }
 0x165   : >>> { %2315 = vset.pattern.permute.xlu1 %v3828_v57  ;;  %v715_v57 = vrot.slane %v2832_v5, %v714_v1 }
 0x166   : >>> { %579 = vperm.xlu1 %2315, %v3980_v61  }
 0x167   : >>> { %v2848_v31 = vrot.slane %v715_v57, %v714_v1  ;;  %v3999_v57 = vmov 3  }
 0x16a   : >>> { %584 = vperm.xlu1 %2315, %v3978_v60  }
 0x16b   : >>> { %v2834_v7 = vpop.permute.xlu0 %519 }
 0x16c   : >>> { %v530_v6 = vpop.permute.xlu1 %529 }
 0x16d   : >>> { %v620_v56 = vmul.f32 %v2844_v27, %v530_v6 }
 0x16e   : >>> { %2316 = vset.pattern.permute.xlu1 %v3843_v58 }
 0x16f   : >>> { %701 = vperm.xlu1 %2316, %v3978_v60   ;;  %v525_v25 = vpop.permute.xlu0 %524 }
 0x170   : >>> { %v2842_v59 = vpop.permute.xlu1 %534  ;;  %v618_v58 = vmul.f32 %v2844_v27, %v525_v25  ;;  %v619_v35 = vmul.f32 %v2846_v30, %v525_v25  ;;  %v621_v25 = vmul.f32 %v2846_v30, %v530_v6 }
 0x173   : >>> { %2317 = vset.pattern.permute.xlu1 %v3998_v0  ;;  %v545_v4 = vpop.permute.xlu0 %544 }
 0x174   : >>> { %835 = vperm.xlu1 %2317, %v3986_v55   ;;  %v626_v23 = vmul.f32 %v2844_v27, %v545_v4  ;;  %v627_v22 = vmul.f32 %v2846_v30, %v545_v4 }
 0x175   : >>> { %v654_v42 = vpop.permute.xlu1 %653 }
 0x176   : >>> { %v732_v43 = vmul.f32 %v2848_v31, %v654_v42  ;;  %v733_v8 = vmul.f32 %v2850_v34, %v654_v42 }
 0x177   : >>> { %v2859_v62 = vpop.permute.xlu0 %554 }
 0x178   : >>> { %v764_v63 = vadd.f32 %v732_v43, %v618_v58  ;;  %v765_v28 = vadd.f32 %v733_v8, %v619_v35  ;;  %2318 = vset.pattern.permute.xlu1 %v3999_v57  ;;  %v4000_v58 = vmov 0   ;;  %v860_v8 = vsub.s32 2, %v3981_v9 }
 0x179   : >>> { %973 = vperm.xlu1 %2318, %v3985_v49   ;;  %v658_v1 = vpop.permute.xlu1 %657  ;;  %v864_v49 = vsub.s32 6, %v3981_v9 }
 0x17a   : >>> { %v734_v55 = vmul.f32 %v2848_v31, %v658_v1  ;;  %v735_v53 = vmul.f32 %v2850_v34, %v658_v1 }
 0x17b   : >>> { %v2866_v42 = vpop.permute.xlu0 %559 }
 0x17c   : >>> { %v766_v26 = vadd.f32 %v734_v55, %v620_v56  ;;  %v767_v24 = vadd.f32 %v735_v53, %v621_v25 }
 0x17d   : >>> { %977 = vperm.xlu1 %2318, %v3984_v48   ;;  %v861_v48 = vrot.slane %v2832_v5, %v860_v8 }
 0x17e   : >>> { %v540_v35 = vpop.permute.xlu1 %539 }
 0x17f   : >>> { %v2869_v43 = vpop.permute.xlu0 %574  ;;  %v624_v1 = vmul.f32 %v2844_v27, %v540_v35  ;;  %v625_v55 = vmul.f32 %v2846_v30, %v540_v35  ;;  %v2893_v16 = vrot.slane %v861_v48, %v860_v8 }
 0x181   : >>> { %2320 = vset.pattern.permute.xlu1 %v4000_v58  ;;  %v865_v58 = vrot.slane %v2832_v5, %v864_v49 }
 0x182   : >>> { %594 = vperm.xlu1 %2320, %v3979_v2  }
 0x183   : >>> { %v666_v6 = vpop.permute.xlu1 %665  ;;  %v2879_v25 = vpop.permute.xlu0 %589  ;;  %v2895_v49 = vrot.slane %v865_v58, %v860_v8 }
 0x184   : >>> { %v738_v53 = vmul.f32 %v2848_v31, %v666_v6  ;;  %v739_v56 = vmul.f32 %v2850_v34, %v666_v6 }
 0x186   : >>> { %v2885_v21 = vadd.f32 %v738_v53, %v624_v1  ;;  %v2887_v20 = vadd.f32 %v739_v56, %v625_v55  ;;  %2321 = vset.pattern.permute.xlu1 %v4001_v19 }
 0x187   : >>> { %705 = vperm.xlu1 %2321, %v3983_v3   ;;  %v670_v35 = vpop.permute.xlu1 %669 }
 0x188   : >>> { %v740_v6 = vmul.f32 %v2848_v31, %v670_v35  ;;  %v741_v18 = vmul.f32 %v2850_v34, %v670_v35  ;;  %v650_v17 = vpop.permute.xlu0 %649 }
 0x189   : >>> { %v730_v12 = vmul.f32 %v2848_v31, %v650_v17  ;;  %v731_v11 = vmul.f32 %v2850_v34, %v650_v17 }
 0x18a   : >>> { %v772_v15 = vadd.f32 %v740_v6, %v626_v23  ;;  %v773_v4 = vadd.f32 %v741_v18, %v627_v22 }
 0x18b   : >>> { %2323 = vset.pattern.permute.xlu1 %v3998_v0 }
 0x18c   : >>> { %843 = vperm.xlu1 %2323, %v3980_v61   ;;  %v800_v1 = vpop.permute.xlu1 %799  ;;  %v2901_v53 = vpop.permute.xlu0 %661 }
 0x18d   : >>> { %v878_v19 = vmul.f32 %v2893_v16, %v800_v1  ;;  %v879_v55 = vmul.f32 %v2895_v49, %v800_v1 }
 0x18f   : >>> { %v2903_v56 = vadd.f32 %v878_v19, %v764_v63  ;;  %v2905_v35 = vadd.f32 %v879_v55, %v765_v28 }
 0x190   : >>> { %847 = vperm.xlu1 %2323, %v3978_v60   ;;  %v804_v48 = vpop.permute.xlu1 %803  ;;  %v2910_v23 = vpop.permute.xlu0 %685 }
 0x191   : >>> { %v880_v18 = vmul.f32 %v2893_v16, %v804_v48  ;;  %v881_v22 = vmul.f32 %v2895_v49, %v804_v48  ;;  %v1006_v48 = vsub.s32 3, %v3981_v9 }
 0x193   : >>> { %v2912_v8 = vadd.f32 %v880_v18, %v766_v26  ;;  %v2914_v58 = vadd.f32 %v881_v22, %v767_v24  ;;  %v1010_v18 = vsub.s32 7, %v3981_v9  ;;  %v631_v22 = vmul.f32 %v2846_v30, %v2859_v62 }
 0x194   : >>> { %2324 = vset.pattern.permute.xlu1 %v3999_v57  ;;  %v2918_v28 = vpop.permute.xlu0 %697 }
 0x195   : >>> { %985 = vperm.xlu1 %2324, %v3982_v54   ;;  %v550_v63 = vpop.permute.xlu1 %549 }
 0x196   : >>> { %v628_v19 = vmul.f32 %v2844_v27, %v550_v63  ;;  %v629_v26 = vmul.f32 %v2846_v30, %v550_v63  ;;  %v616_v63 = vmul.f32 %v2844_v27, %v2834_v7 }
 0x198   : >>> { %v2921_v6 = vpop.permute.xlu0 %709  ;;  %v762_v10 = vadd.f32 %v730_v12, %v616_v63 }
 0x199   : >>> { %2325 = vset.pattern.permute.xlu1 %v3998_v0  ;;  %v630_v0 = vmul.f32 %v2844_v27, %v2859_v62 }
 0x19a   : >>> { %851 = vperm.xlu1 %2325, %v3983_v3   ;;  %v674_v1 = vpop.permute.xlu1 %673 }
 0x19b   : >>> { %v742_v24 = vmul.f32 %v2848_v31, %v674_v1  ;;  %v743_v55 = vmul.f32 %v2850_v34, %v674_v1  ;;  %v617_v1 = vmul.f32 %v2846_v30, %v2834_v7  ;;  %v1007_v7 = vrot.slane %v2832_v5, %v1006_v48 }
 0x19d   : >>> { %v2934_v3 = vadd.f32 %v742_v24, %v628_v19  ;;  %v2936_v54 = vadd.f32 %v743_v55, %v629_v26  ;;  %v796_v13 = vpop.permute.xlu0 %795  ;;  %v763_v9 = vadd.f32 %v731_v11, %v617_v1 }
 0x19e   : >>> { %2327 = vset.pattern.permute.xlu1 %v3999_v57  ;;  %v678_v14 = vpop.permute.xlu1 %677  ;;  %v1011_v57 = vrot.slane %v2832_v5, %v1010_v18  ;;  %v876_v51 = vmul.f32 %v2893_v16, %v796_v13  ;;  %v877_v17 = vmul.f32 %v2895_v49, %v796_v13 }
 0x19f   : >>> { %v744_v62 = vmul.f32 %v2848_v31, %v678_v14  ;;  %v745_v19 = vmul.f32 %v2850_v34, %v678_v14  ;;  %989 = vperm.xlu1 %2327, %v3980_v61  }
 0x1a0   : >>> { %v908_v12 = vadd.f32 %v876_v51, %v762_v10  ;;  %v909_v18 = vadd.f32 %v877_v17, %v763_v9  ;;  %v622_v9 = vmul.f32 %v2844_v27, %v2842_v59  ;;  %v623_v10 = vmul.f32 %v2846_v30, %v2842_v59 }
 0x1a1   : >>> { %v2948_v26 = vadd.f32 %v744_v62, %v630_v0  ;;  %v2950_v24 = vadd.f32 %v745_v19, %v631_v22  ;;  %v808_v55 = vpop.permute.xlu0 %807  ;;  %v2959_v22 = vrot.slane %v1007_v7, %v1006_v48  ;;  %v2961_v62 = vrot.slane %v1011_v57, %v1006_v48 }
 0x1a2   : >>> { %v736_v7 = vmul.f32 %v2848_v31, %v2901_v53  ;;  %v737_v48 = vmul.f32 %v2850_v34, %v2901_v53  ;;  %v882_v51 = vmul.f32 %v2893_v16, %v808_v55  ;;  %v883_v57 = vmul.f32 %v2895_v49, %v808_v55 }
 0x1a3   : >>> { %993 = vperm.xlu1 %2327, %v3978_v60   ;;  %v816_v14 = vpop.permute.xlu1 %815 }
 0x1a4   : >>> { %v886_v61 = vmul.f32 %v2893_v16, %v816_v14  ;;  %v887_v0 = vmul.f32 %v2895_v49, %v816_v14  ;;  %v768_v53 = vadd.f32 %v736_v7, %v622_v9 }
 0x1a5   : >>> { %v812_v11 = vpop.permute.xlu0 %811 }
 0x1a6   : >>> { %v2963_v19 = vadd.f32 %v886_v61, %v772_v15  ;;  %v2965_v5 = vadd.f32 %v887_v0, %v773_v4  ;;  %v914_v59 = vadd.f32 %v882_v51, %v768_v53  ;;  %v884_v51 = vmul.f32 %v2893_v16, %v812_v11 }
 0x1a7   : >>> { %1001 = vperm.xlu1 %2327, %v3979_v2  }
 0x1a8   : >>> { %v942_v13 = vpop.permute.xlu1 %941 }
 0x1a9   : >>> { %v1022_v63 = vmul.f32 %v2959_v22, %v942_v13  ;;  %v1023_v1 = vmul.f32 %v2961_v62, %v942_v13  ;;  %v2974_v15 = vpop.permute.xlu0 %827  ;;  %v769_v13 = vadd.f32 %v737_v48, %v623_v10 }
 0x1ab   : >>> { %v1054_v61 = vadd.f32 %v1022_v63, %v908_v12  ;;  %v1055_v4 = vadd.f32 %v1023_v1, %v909_v18  ;;  %v915_v60 = vadd.f32 %v883_v57, %v769_v13  ;;  %v885_v57 = vmul.f32 %v2895_v49, %v812_v11 }
 0x1ac   : >>> { %v950_v17 = vpop.permute.xlu1 %949  ;;  %v916_v13 = vadd.f32 %v884_v51, %v2885_v21 }
 0x1ad   : >>> { %v1026_v14 = vmul.f32 %v2959_v22, %v950_v17  ;;  %v1027_v0 = vmul.f32 %v2961_v62, %v950_v17  ;;  %v1086_v2 = vmul.f32 2.0, %v1054_v61  ;;  %v1087_v12 = vmul.f32 2.0, %v1055_v4  ;;  %v2984_v18 = vpop.permute.xlu0 %839 }
 0x1af   : >>> { %v1058_v63 = vadd.f32 %v1026_v14, %v2912_v8  ;;  %v1059_v1 = vadd.f32 %v1027_v0, %v2914_v58  ;;  %v2991_v7 = vsub.f32 %v3976_v32, %v1086_v2  ;;  %v2994_v48 = vsub.f32 %v3976_v32, %v1087_v12 }
 0x1b0   : >>> { %v954_v52 = vpop.permute.xlu1 %953  ;;  %v917_v12 = vadd.f32 %v885_v57, %v2887_v20 }
 0x1b1   : >>> { %v1090_v47 = vmul.f32 2.0, %v1058_v63  ;;  %v1091_v55 = vmul.f32 2.0, %v1059_v1  ;;  %v1028_v50 = vmul.f32 %v2959_v22, %v954_v52  ;;  %v1029_v45 = vmul.f32 %v2961_v62, %v954_v52  ;;  %v2996_v61 = vpop.permute.xlu0 %855 }
 0x1b3   : >>> { %v2999_v8 = vsub.f32 %v3977_v29, %v1090_v47  ;;  %v3002_v58 = vsub.f32 %v3977_v29, %v1091_v55  ;;  %v1060_v4 = vadd.f32 %v1028_v50, %v914_v59  ;;  %v1061_v9 = vadd.f32 %v1029_v45, %v915_v60 }
 0x1b5   : >>> { %4002 = vst [vmem:[#allocation52_spill] sm:$0xff] %v3002_v58  ;;  %v1150_v10 = vmin.f32 %v2991_v7, %v2999_v8  ;;  %v1171_v2 = vmin.f32 %v2994_v48, %v3002_v58  ;;  %v3008_v52 = vpop.permute.xlu1 %564  ;;  %v1092_v0 = vmul.f32 2.0, %v1060_v4  ;;  %v1093_v50 = vmul.f32 2.0, %v1061_v9 }
 0x1b6   : >>> { %v946_v17 = vpop.permute.xlu0 %945 }
 0x1b7   : >>> { %v1024_v47 = vmul.f32 %v2959_v22, %v946_v17  ;;  %v1025_v14 = vmul.f32 %v2961_v62, %v946_v17  ;;  %v3023_v4 = vsub.f32 %v3975_v33, %v1092_v0 }
 0x1b9   : >>> { %v1056_v60 = vadd.f32 %v1024_v47, %v2903_v56  ;;  %v1057_v45 = vadd.f32 %v1025_v14, %v2905_v35  ;;  %4003 = vst [vmem:[#allocation53_spill] sm:$0xff] %v3023_v4  ;;  %v3026_v56 = vsub.f32 %v3975_v33, %v1093_v50 }
 0x1ba   : >>> { %v3016_v53 = vpop.permute.xlu1 %681  ;;  %v958_v63 = vpop.permute.xlu0 %957 }
 0x1bb   : >>> { %v1088_v1 = vmul.f32 2.0, %v1056_v60  ;;  %v1089_v11 = vmul.f32 2.0, %v1057_v45  ;;  %v1030_v59 = vmul.f32 %v2959_v22, %v958_v63  ;;  %v1031_v55 = vmul.f32 %v2961_v62, %v958_v63  ;;  %4004 = vst [vmem:[#allocation54_spill] sm:$0xff] %v3026_v56 }
 0x1bd   : >>> { %v3029_v35 = vsub.f32 %v3974_v36, %v1088_v1  ;;  %v3032_v21 = vsub.f32 %v3974_v36, %v1089_v11  ;;  %v1062_v20 = vadd.f32 %v1030_v59, %v916_v13  ;;  %v1063_v9 = vadd.f32 %v1031_v55, %v917_v12 }
 0x1be   : >>> { %v970_v13 = vpop.permute.xlu0 %969 }
 0x1bf   : >>> { %v820_v51 = vpop.permute.xlu1 %819  ;;  %v1151_v57 = vmin.f32 %v3029_v35, %v3023_v4  ;;  %v1172_v17 = vmin.f32 %v3032_v21, %v3026_v56  ;;  %v1094_v47 = vmul.f32 2.0, %v1062_v20  ;;  %v1095_v14 = vmul.f32 2.0, %v1063_v9 }
 0x1c0   : >>> { %v888_v0 = vmul.f32 %v2893_v16, %v820_v51  ;;  %v889_v50 = vmul.f32 %v2895_v49, %v820_v51  ;;  %v1036_v9 = vmul.f32 %v2959_v22, %v970_v13  ;;  %v1037_v51 = vmul.f32 %v2961_v62, %v970_v13 }
 0x1c1   : >>> { %v3041_v60 = vsub.f32 %v3972_v38, %v1094_v47  ;;  %v3044_v45 = vsub.f32 %v3972_v38, %v1095_v14 }
 0x1c2   : >>> { %v920_v12 = vadd.f32 %v888_v0, %v2934_v3  ;;  %v921_v63 = vadd.f32 %v889_v50, %v2936_v54 }
 0x1c3   : >>> { %4005 = vst [vmem:[#allocation55_spill] sm:$0xff] %v3041_v60  ;;  %4006 = vst [vmem:[#allocation56_spill] sm:$0xff] %v3044_v45  ;;  %v824_v1 = vpop.permute.xlu1 %823  ;;  %v3049_v11 = vmin.f32 %v1150_v10, %v3041_v60  ;;  %v3052_v59 = vmin.f32 %v1171_v2, %v3044_v45 }
 0x1c4   : >>> { %v890_v55 = vmul.f32 %v2893_v16, %v824_v1  ;;  %v891_v20 = vmul.f32 %v2895_v49, %v824_v1 }
 0x1c6   : >>> { %v922_v47 = vadd.f32 %v890_v55, %v2948_v26  ;;  %v923_v3 = vadd.f32 %v891_v20, %v2950_v24 }
 0x1c8   : >>> { %v962_v54 = vpop.permute.xlu1 %961  ;;  %v1068_v14 = vadd.f32 %v1036_v9, %v922_v47  ;;  %v1069_v0 = vadd.f32 %v1037_v51, %v923_v3 }
 0x1c9   : >>> { %v1032_v10 = vmul.f32 %v2959_v22, %v962_v54  ;;  %v1033_v2 = vmul.f32 %v2961_v62, %v962_v54 }
 0x1ca   : >>> { %v1100_v1 = vmul.f32 2.0, %v1068_v14  ;;  %v1101_v32 = vmul.f32 2.0, %v1069_v0 }
 0x1cb   : >>> { %v1064_v50 = vadd.f32 %v1032_v10, %v2963_v19  ;;  %v1065_v29 = vadd.f32 %v1033_v2, %v2965_v5 }
 0x1cc   : >>> { %v3071_v55 = vsub.f32 %v3971_v39, %v1100_v1  ;;  %v3074_v20 = vsub.f32 %v3971_v39, %v1101_v32 }
 0x1cd   : >>> { %v1096_v33 = vmul.f32 2.0, %v1064_v50  ;;  %v1097_v36 = vmul.f32 2.0, %v1065_v29  ;;  %v570_v13 = vpop.permute.xlu1 %569 }
 0x1ce   : >>> { %v636_v29 = vmul.f32 %v2844_v27, %v570_v13 }
 0x1cf   : >>> { %v3065_v26 = vsub.f32 %v3973_v37, %v1096_v33  ;;  %v3068_v24 = vsub.f32 %v3973_v37, %v1097_v36  ;;  %v637_v33 = vmul.f32 %v2846_v30, %v570_v13  ;;  %v892_v37 = vmul.f32 %v2893_v16, %v2974_v15 }
 0x1d1   : >>> { %4007 = vst [vmem:[#allocation57_spill] sm:$0xff] %v3065_v26  ;;  %4008 = vst [vmem:[#allocation58_spill] sm:$0xff] %v3068_v24  ;;  %v3077_v19 = vmin.f32 %v1151_v57, %v3065_v26  ;;  %v3080_v5 = vmin.f32 %v1172_v17, %v3068_v24 }
 0x1d2   : >>> { %v690_v9 = vpop.permute.xlu1 %689 }
 0x1d3   : >>> { %v750_v36 = vmul.f32 %v2848_v31, %v690_v9  ;;  %v751_v51 = vmul.f32 %v2850_v34, %v690_v9 }
 0x1d5   : >>> { %v782_v57 = vadd.f32 %v750_v36, %v636_v29  ;;  %v783_v3 = vadd.f32 %v751_v51, %v637_v33 }
 0x1d6   : >>> { %v3090_v54 = vpop.permute.xlu1 %693 }
 0x1db   : >>> { %v832_v17 = vpop.permute.xlu1 %831 }
 0x1e0   : >>> { %v966_v14 = vpop.permute.xlu1 %965 }
 0x1e1   : >>> { %v1034_v0 = vmul.f32 %v2959_v22, %v966_v14  ;;  %v1035_v10 = vmul.f32 %v2961_v62, %v966_v14  ;;  %v633_v14 = vmul.f32 %v2846_v30, %v2866_v42 }
 0x1e3   : >>> { %v1066_v2 = vadd.f32 %v1034_v0, %v920_v12  ;;  %v1067_v50 = vadd.f32 %v1035_v10, %v921_v63  ;;  %v632_v63 = vmul.f32 %v2844_v27, %v2866_v42  ;;  %v746_v0 = vmul.f32 %v2848_v31, %v3016_v53 }
 0x1e4   : >>> { %v747_v10 = vmul.f32 %v2850_v34, %v3016_v53  ;;  %v893_v53 = vmul.f32 %v2895_v49, %v2974_v15 }
 0x1e5   : >>> { %v1098_v1 = vmul.f32 2.0, %v1066_v2  ;;  %v1099_v13 = vmul.f32 2.0, %v1067_v50  ;;  %v3094_v9 = vpop.permute.xlu1 %579  ;;  %v749_v2 = vmul.f32 %v2850_v34, %v2910_v23  ;;  %v778_v38 = vadd.f32 %v746_v0, %v632_v63 }
 0x1e6   : >>> { %v779_v39 = vadd.f32 %v747_v10, %v633_v14 }
 0x1e7   : >>> { %v3097_v47 = vsub.f32 %v3970_v40, %v1098_v1  ;;  %v3100_v29 = vsub.f32 %v3970_v40, %v1099_v13  ;;  %v635_v40 = vmul.f32 %v2846_v30, %v3008_v52  ;;  %v924_v60 = vadd.f32 %v892_v37, %v778_v38 }
 0x1e8   : >>> { %v925_v56 = vadd.f32 %v893_v53, %v779_v39  ;;  %v4012_v53 = vmin.f32 %v3080_v5, %v3074_v20 }
 0x1e9   : >>> { %4009 = vst [vmem:[#allocation59_spill] sm:$0xff] %v3097_v47  ;;  %4010 = vst [vmem:[#allocation60_spill] sm:$0xff] %v3100_v29  ;;  %v1154_v33 = vmin.f32 %v3049_v11, %v3097_v47  ;;  %v1175_v36 = vmin.f32 %v3052_v59, %v3100_v29  ;;  %v3106_v51 = vpop.permute.xlu1 %584  ;;  %v982_v11 = vpop.permute.xlu0 %981  ;;  %v748_v59 = vmul.f32 %v2848_v31, %v2910_v23 }
 0x1ea   : >>> { %v1042_v42 = vmul.f32 %v2959_v22, %v982_v11  ;;  %v1043_v32 = vmul.f32 %v2961_v62, %v982_v11  ;;  %v634_v23 = vmul.f32 %v2844_v27, %v3008_v52  ;;  %v894_v47 = vmul.f32 %v2893_v16, %v832_v17 }
 0x1eb   : >>> { %v895_v11 = vmul.f32 %v2895_v49, %v832_v17  ;;  %v781_v0 = vadd.f32 %v749_v2, %v635_v40 }
 0x1ec   : >>> { %v780_v14 = vadd.f32 %v748_v59, %v634_v23 }
 0x1ee   : >>> { %v3108_v12 = vpop.permute.xlu1 %701  ;;  %v926_v52 = vadd.f32 %v894_v47, %v780_v14  ;;  %v752_v14 = vmul.f32 %v2848_v31, %v3090_v54 }
 0x1f3   : >>> { %v836_v50 = vpop.permute.xlu1 %835 }
 0x1f4   : >>> { %v896_v1 = vmul.f32 %v2893_v16, %v836_v50  ;;  %v897_v13 = vmul.f32 %v2895_v49, %v836_v50 }
 0x1f6   : >>> { %v928_v29 = vadd.f32 %v896_v1, %v782_v57  ;;  %v929_v50 = vadd.f32 %v897_v13, %v783_v3  ;;  %v927_v57 = vadd.f32 %v895_v11, %v781_v0  ;;  %v753_v0 = vmul.f32 %v2850_v34, %v3090_v54 }
 0x1f7   : >>> { %v755_v54 = vmul.f32 %v2850_v34, %v2918_v28 }
 0x1f8   : >>> { %v1074_v24 = vadd.f32 %v1042_v42, %v928_v29  ;;  %v1075_v26 = vadd.f32 %v1043_v32, %v929_v50  ;;  %v974_v45 = vpop.permute.xlu1 %973 }
 0x1f9   : >>> { %v1038_v15 = vmul.f32 %v2959_v22, %v974_v45  ;;  %v1039_v63 = vmul.f32 %v2961_v62, %v974_v45 }
 0x1fa   : >>> { %v1106_v3 = vmul.f32 2.0, %v1074_v24  ;;  %v1107_v1 = vmul.f32 2.0, %v1075_v26 }
 0x1fb   : >>> { %v1070_v10 = vadd.f32 %v1038_v15, %v924_v60  ;;  %v1071_v4 = vadd.f32 %v1039_v63, %v925_v56  ;;  %v2406_v15 = vmov 0.0  }
 0x1fc   : >>> { %v978_v13 = vpop.permute.xlu1 %977  ;;  %v3147_v56 = vsub.f32 %v2713_v46, %v1106_v3  ;;  %v3150_v45 = vsub.f32 %v2713_v46, %v1107_v1  ;;  %1494 = vmatprep.mubr.f32.mxu0 %v2406_v15 }
 0x1fd   : >>> { %v1102_v58 = vmul.f32 2.0, %v1070_v10  ;;  %v1103_v17 = vmul.f32 2.0, %v1071_v4  ;;  %v1040_v32 = vmul.f32 %v2959_v22, %v978_v13  ;;  %v1041_v37 = vmul.f32 %v2961_v62, %v978_v13 }
 0x1fe   : >>> { %v639_v10 = vmul.f32 %v2846_v30, %v2869_v43  ;;  %v754_v13 = vmul.f32 %v2848_v31, %v2918_v28 }
 0x1ff   : >>> { %v3141_v38 = vsub.f32 %v2709_v44, %v1102_v58  ;;  %v3144_v39 = vsub.f32 %v2709_v44, %v1103_v17  ;;  %v1072_v40 = vadd.f32 %v1040_v32, %v926_v52  ;;  %v1073_v60 = vadd.f32 %v1041_v37, %v927_v57 }
 0x200   : >>> { %v898_v52 = vmul.f32 %v2893_v16, %v2984_v18  ;;  %v899_v57 = vmul.f32 %v2895_v49, %v2984_v18  ;;  %v785_v1 = vadd.f32 %v753_v0, %v639_v10  ;;  %v640_v17 = vmul.f32 %v2844_v27, %v3094_v9 }
 0x201   : >>> { %v3153_v4 = vmin.f32 %v1154_v33, %v3141_v38  ;;  %v3156_v26 = vmin.f32 %v1175_v36, %v3144_v39  ;;  %v1104_v24 = vmul.f32 2.0, %v1072_v40  ;;  %v1105_v58 = vmul.f32 2.0, %v1073_v60  ;;  %v595_v47 = vpop.permute.xlu1 %594 }
 0x202   : >>> { %v4011_v33 = vmin.f32 %v3077_v19, %v3071_v55  ;;  %v638_v19 = vmul.f32 %v2844_v27, %v2869_v43  ;;  %v641_v43 = vmul.f32 %v2846_v30, %v3094_v9  ;;  %v644_v32 = vmul.f32 %v2844_v27, %v2879_v25 }
 0x203   : >>> { %v3159_v29 = vsub.f32 %v2707_v41, %v1104_v24  ;;  %v3162_v59 = vsub.f32 %v2707_v41, %v1105_v58  ;;  %v1158_v2 = vmin.f32 %v3153_v4, %v3147_v56  ;;  %v645_v18 = vmul.f32 %v2846_v30, %v2879_v25 }
 0x204   : >>> { %v784_v3 = vadd.f32 %v752_v14, %v638_v19  ;;  %v760_v37 = vmul.f32 %v2848_v31, %v2921_v6  ;;  %v761_v40 = vmul.f32 %v2850_v34, %v2921_v6  ;;  %v931_v58 = vadd.f32 %v899_v57, %v785_v1  ;;  %v998_v1 = vpop.permute.xlu0 %997 }
 0x205   : >>> { %v3172_v36 = vmin.f32 %v4011_v33, %v3159_v29  ;;  %v3178_v23 = vmin.f32 %v4012_v53, %v3162_v59  ;;  %v786_v9 = vadd.f32 %v754_v13, %v640_v17  ;;  %v787_v53 = vadd.f32 %v755_v54, %v641_v43 }
 0x206   : >>> { %v706_v50 = vpop.permute.xlu1 %705  ;;  %v930_v24 = vadd.f32 %v898_v52, %v784_v3  ;;  %v642_v25 = vmul.f32 %v2844_v27, %v3106_v51  ;;  %v643_v0 = vmul.f32 %v2846_v30, %v3106_v51  ;;  %v757_v10 = vmul.f32 %v2850_v34, %v3108_v12 }
 0x207   : >>> { %v758_v28 = vmul.f32 %v2848_v31, %v706_v50  ;;  %v759_v60 = vmul.f32 %v2850_v34, %v706_v50  ;;  %v756_v50 = vmul.f32 %v2848_v31, %v3108_v12  ;;  %v646_v52 = vmul.f32 %v2844_v27, %v595_v47 }
 0x209   : >>> { %v790_v57 = vadd.f32 %v758_v28, %v644_v32  ;;  %v791_v3 = vadd.f32 %v759_v60, %v645_v18  ;;  %v788_v12 = vadd.f32 %v756_v50, %v642_v25  ;;  %v1050_v32 = vmul.f32 %v2959_v22, %v998_v1 }
 0x20a   : >>> { %v1051_v18 = vmul.f32 %v2961_v62, %v998_v1  ;;  %v907_v50 = vmul.f32 %v2895_v49, %v2996_v61 }
 0x20b   : >>> { %v844_v11 = vpop.permute.xlu1 %843 }
 0x20c   : >>> { %v900_v15 = vmul.f32 %v2893_v16, %v844_v11  ;;  %v901_v14 = vmul.f32 %v2895_v49, %v844_v11  ;;  %v647_v11 = vmul.f32 %v2846_v30, %v595_v47  ;;  %v789_v47 = vadd.f32 %v757_v10, %v643_v0 }
 0x20d   : >>> { %v906_v0 = vmul.f32 %v2893_v16, %v2996_v61 }
 0x20e   : >>> { %v932_v54 = vadd.f32 %v900_v15, %v786_v9  ;;  %v933_v17 = vadd.f32 %v901_v14, %v787_v53  ;;  %v792_v53 = vadd.f32 %v760_v37, %v646_v52  ;;  %v793_v15 = vadd.f32 %v761_v40, %v647_v11 }
 0x20f   : >>> { %v848_v63 = vpop.permute.xlu1 %847 }
 0x210   : >>> { %v903_v31 = vmul.f32 %v2895_v49, %v848_v63  ;;  %v938_v1 = vadd.f32 %v906_v0, %v792_v53 }
 0x212   : >>> { %v935_v14 = vadd.f32 %v903_v31, %v789_v47 }
 0x214   : >>> { %v986_v5 = vpop.permute.xlu1 %985 }
 0x215   : >>> { %v1044_v6 = vmul.f32 %v2959_v22, %v986_v5  ;;  %v1045_v19 = vmul.f32 %v2961_v62, %v986_v5  ;;  %v902_v5 = vmul.f32 %v2893_v16, %v848_v63 }
 0x217   : >>> { %v1076_v42 = vadd.f32 %v1044_v6, %v930_v24  ;;  %v1077_v34 = vadd.f32 %v1045_v19, %v931_v58  ;;  %v934_v63 = vadd.f32 %v902_v5, %v788_v12  ;;  %v4014_v5 = vld [vmem:[#allocation47_spill] sm:$0xff] }
 0x219   : >>> { %v852_v33 = vpop.permute.xlu1 %851  ;;  %v1108_v58 = vmul.f32 2.0, %v1076_v42  ;;  %v1109_v6 = vmul.f32 2.0, %v1077_v34  ;;  %v939_v42 = vadd.f32 %v907_v50, %v793_v15  ;;  %v4017_v15 = vld [vmem:[#allocation49_spill] sm:$0xff] }
 0x21a   : >>> { %v904_v13 = vmul.f32 %v2893_v16, %v852_v33  ;;  %v905_v51 = vmul.f32 %v2895_v49, %v852_v33 }
 0x21c   : >>> { %v936_v28 = vadd.f32 %v904_v13, %v790_v57  ;;  %v937_v60 = vadd.f32 %v905_v51, %v791_v3  ;;  %v4013_v13 = vld [vmem:[#allocation45_spill] sm:$0xff] }
 0x21d   : >>> { %v3239_v51 = vsub.f32 %v4013_v13, %v1108_v58 }
 0x21e   : >>> { %v990_v43 = vpop.permute.xlu1 %989  ;;  %v1082_v3 = vadd.f32 %v1050_v32, %v936_v28  ;;  %v1083_v37 = vadd.f32 %v1051_v18, %v937_v60 }
 0x21f   : >>> { %v1046_v27 = vmul.f32 %v2959_v22, %v990_v43  ;;  %v1047_v30 = vmul.f32 %v2961_v62, %v990_v43  ;;  %v1159_v28 = vmin.f32 %v3172_v36, %v3239_v51 }
 0x220   : >>> { %v1114_v34 = vmul.f32 2.0, %v1082_v3 }
 0x221   : >>> { %v1078_v33 = vadd.f32 %v1046_v27, %v932_v54  ;;  %v1079_v9 = vadd.f32 %v1047_v30, %v933_v17  ;;  %v3242_v54 = vsub.f32 %v4013_v13, %v1109_v6  ;;  %v1115_v27 = vmul.f32 2.0, %v1083_v37  ;;  %v4015_v30 = vld [vmem:[#allocation46_spill] sm:$0xff] }
 0x222   : >>> { %v994_v24 = vpop.permute.xlu1 %993 }
 0x223   : >>> { %v1048_v19 = vmul.f32 %v2959_v22, %v994_v24  ;;  %v1049_v25 = vmul.f32 %v2961_v62, %v994_v24  ;;  %v1110_v10 = vmul.f32 2.0, %v1078_v33  ;;  %v1111_v57 = vmul.f32 2.0, %v1079_v9  ;;  %v4018_v24 = vld [vmem:[#allocation48_spill] sm:$0xff] }
 0x224   : >>> { %v1180_v60 = vmin.f32 %v3178_v23, %v3242_v54  ;;  %v3274_v36 = vsub.f32 %v4017_v15, %v1115_v27  ;;  %v4022_v27 = vld [vmem:[#allocation55_spill] sm:$0xff] }
 0x225   : >>> { %v1080_v40 = vadd.f32 %v1048_v19, %v934_v63  ;;  %v1081_v52 = vadd.f32 %v1049_v25, %v935_v14  ;;  %v3245_v31 = vsub.f32 %v4014_v5, %v1110_v10  ;;  %v3248_v49 = vsub.f32 %v4014_v5, %v1111_v57 }
 0x226   : >>> { %v1002_v11 = vpop.permute.xlu1 %1001  ;;  %v3271_v63 = vsub.f32 %v4017_v15, %v1114_v34  ;;  %v4021_v34 = vld [vmem:[#allocation54_spill] sm:$0xff] }
 0x227   : >>> { %v1112_v17 = vmul.f32 2.0, %v1080_v40  ;;  %v1113_v16 = vmul.f32 2.0, %v1081_v52  ;;  %v1052_v61 = vmul.f32 %v2959_v22, %v1002_v11  ;;  %v1053_v43 = vmul.f32 %v2961_v62, %v1002_v11 }
 0x228   : >>> { %v1160_v22 = vmin.f32 %v1158_v2, %v3245_v31  ;;  %v4016_v62 = vmin.f32 %v3156_v26, %v3150_v45 }
 0x229   : >>> { %v3253_v12 = vsub.f32 %v4015_v30, %v1112_v17  ;;  %v3256_v47 = vsub.f32 %v4015_v30, %v1113_v16  ;;  %v1084_v32 = vadd.f32 %v1052_v61, %v938_v1  ;;  %v1085_v18 = vadd.f32 %v1053_v43, %v939_v42  ;;  %v4019_v61 = vld [vmem:[#allocation52_spill] sm:$0xff]  ;;  %v4020_v43 = vld [vmem:[#allocation53_spill] sm:$0xff] }
 0x22a   : >>> { %v1181_v33 = vmin.f32 %v4016_v62, %v3248_v49  ;;  %v1162_v26 = vmin.f32 %v1160_v22, %v3271_v63  ;;  %v4027_v22 = vld [vmem:[#allocation60_spill] sm:$0xff] }
 0x22b   : >>> { %v1116_v9 = vmul.f32 2.0, %v1084_v32  ;;  %v1117_v53 = vmul.f32 2.0, %v1085_v18  ;;  %v1161_v23 = vmin.f32 %v1159_v28, %v3253_v12  ;;  %v1182_v14 = vmin.f32 %v1180_v60, %v3256_v47  ;;  %v4023_v32 = vld [vmem:[#allocation56_spill] sm:$0xff]  ;;  %v4024_v18 = vld [vmem:[#allocation57_spill] sm:$0xff]  ;;  %v4025_v28 = vld [vmem:[#allocation58_spill] sm:$0xff] }
 0x22c   : >>> { %v1183_v58 = vmin.f32 %v1181_v33, %v3274_v36  ;;  %v4026_v60 = vld [vmem:[#allocation59_spill] sm:$0xff]  ;;  %v4028_v62 = vld [vmem:[#allocation4_spill] sm:$0xff] }
 0x22d   : >>> { %v3279_v4 = vsub.f32 %v4018_v24, %v1116_v9  ;;  %v3282_v2 = vsub.f32 %v4018_v24, %v1117_v53  ;;  %v4029_v53 = vld [vmem:[#allocation5_spill] sm:$0xff] }
 0x22f   : >>> { %v1163_v6 = vmin.f32 %v1161_v23, %v3279_v4  ;;  %v1184_v19 = vmin.f32 %v1182_v14, %v3282_v2  ;;  %v4030_v23 = vmov %v4029_v53 }
 0x231   : >>> { %v1164_v25 = vmin.f32 %v1162_v26, %v1163_v6  ;;  %v1185_v0 = vmin.f32 %v1183_v58, %v1184_v19  ;;  %v4031_v58 = vld [vmem:[#allocation6_spill] sm:$0xff]  ;;  %v4032_v6 = vld [vmem:[#allocation7_spill] sm:$0xff]  ;;  %v4033_v19 = vld [vmem:[#allocation8_spill] sm:$0xff] }
 0x233   : >>> { %v1165_v50 = vrot.slane %v1164_v25, 4  ;;  %v1186_v10 = vrot.slane %v1185_v0, 4 }
 0x235   : >>> { %v1166_v57 = vmin.f32 %v1164_v25, %v1165_v50  ;;  %v1187_v3 = vmin.f32 %v1185_v0, %v1186_v10  ;;  %v4035_v0 = vld [vmem:[#allocation9_spill] sm:$0xff] }
 0x237   : >>> { %v1167_v37 = vrot.slane %v1166_v57, 2  ;;  %v1188_v40 = vrot.slane %v1187_v3, 2 }
 0x239   : >>> { %v1168_v52 = vmin.f32 %v1166_v57, %v1167_v37  ;;  %v1189_v11 = vmin.f32 %v1187_v3, %v1188_v40  ;;  %v4038_v57 = vld [vmem:[#allocation10_spill] sm:$0xff]  ;;  %v4041_v40 = vld [vmem:[#allocation11_spill] sm:$0xff] }
 0x23b   : >>> { %v1169_v1 = vrot.slane %v1168_v52, 1  ;;  %v1190_v42 = vrot.slane %v1189_v11, 1 }
 0x23d   : >>> { %v3288_v17 = vmin.f32 %v1168_v52, %v1169_v1  ;;  %v3290_v16 = vmin.f32 %v1189_v11, %v1190_v42  ;;  %v4044_v1 = vld [vmem:[#allocation12_spill] sm:$0xff] }
 0x23f   : >>> { %vm1192_vm1 = vcmp.eq.f32.partialorder %v2991_v7, %v3288_v17  ;;  %vm1193_vm2 = vcmp.eq.f32.partialorder %v2994_v48, %v3290_v16  ;;  %vm1194_vm3 = vcmp.eq.f32.partialorder %v3029_v35, %v3288_v17  ;;  %vm1195_vm4 = vcmp.eq.f32.partialorder %v3032_v21, %v3290_v16 }
 0x240   : >>> { %vm1196_vm5 = vcmp.eq.f32.partialorder %v2999_v8, %v3288_v17  ;;  %vm1197_vm6 = vcmp.eq.f32.partialorder %v4019_v61, %v3290_v16  ;;  %vm1198_vm7 = vcmp.eq.f32.partialorder %v4020_v43, %v3288_v17  ;;  %vm1199_vm8 = vcmp.eq.f32.partialorder %v4021_v34, %v3290_v16  ;;  %v4047_v43 = vld [vmem:[#allocation13_spill] sm:$0xff]  ;;  %v4050_v34 = vld [vmem:[#allocation14_spill] sm:$0xff] }
 0x241   : >>> { %vm1200_vm9 = vcmp.eq.f32.partialorder %v4022_v27, %v3288_v17  ;;  %vm1217_vm12 = vcmp.eq.f32.partialorder %v3248_v49, %v3290_v16  ;;  %vm1218_vm13 = vcmp.eq.f32.partialorder %v3253_v12, %v3288_v17  ;;  %vm1219_vm14 = vcmp.eq.f32.partialorder %v3256_v47, %v3290_v16  ;;  %v4053_v27 = vld [vmem:[#allocation15_spill] sm:$0xff] }
 0x242   : >>> { %vm1220_vm15 = vcmp.eq.f32.partialorder %v3271_v63, %v3288_v17  ;;  %vm1221_vm0 = vcmp.eq.f32.partialorder %v3274_v36, %v3290_v16  ;;  %vm1222_vm10 = vcmp.eq.f32.partialorder %v3279_v4, %v3288_v17  ;;  %vm1223_vm11 = vcmp.eq.f32.partialorder %v3282_v2, %v3290_v16 }
 0x243   : >>> { %v1224_v33 = vsel %vm1192_vm1, %v4028_v62, 128  ;;  %v1225_v9 = vsel %vm1193_vm2, %v4028_v62, 128  ;;  %v1226_v14 = vsel %vm1194_vm3, %v4029_v53, 128  ;;  %v1227_v26 = vsel %vm1195_vm4, %v4030_v23, 128 }
 0x244   : >>> { %v1228_v7 = vsel %vm1196_vm5, %v4031_v58, 128  ;;  %v1229_v48 = vsel %vm1197_vm6, %v4031_v58, 128  ;;  %v1230_v35 = vsel %vm1198_vm7, %v4032_v6, 128  ;;  %v1231_v21 = vsel %vm1199_vm8, %v4032_v6, 128 }
 0x245   : >>> { %v1232_v8 = vsel %vm1200_vm9, %v4033_v19, 128  ;;  %vm4034_vm1 = vcmp.eq.f32.partialorder %v4023_v32, %v3290_v16  ;;  %vm4036_vm2 = vcmp.eq.f32.partialorder %v4024_v18, %v3288_v17  ;;  %vm4037_vm3 = vcmp.eq.f32.partialorder %v4025_v28, %v3290_v16  ;;  %v4056_v32 = vld [vmem:[#allocation16_spill] sm:$0xff]  ;;  %v4058_v18 = vld [vmem:[#allocation17_spill] sm:$0xff]  ;;  %v4059_v28 = vld [vmem:[#allocation18_spill] sm:$0xff] }
 0x246   : >>> { %v1233_v25 = vsel %vm4034_vm1, %v4033_v19, 128  ;;  %v1234_v50 = vsel %vm4036_vm2, %v4035_v0, 128  ;;  %v1235_v10 = vsel %vm4037_vm3, %v4035_v0, 128  ;;  %vm4039_vm4 = vcmp.eq.f32.partialorder %v4026_v60, %v3288_v17  ;;  %v4060_v60 = vld [vmem:[#allocation19_spill] sm:$0xff] }
 0x247   : >>> { %v1236_v3 = vsel %vm4039_vm4, %v4038_v57, 128  ;;  %vm4040_vm5 = vcmp.eq.f32.partialorder %v4027_v22, %v3290_v16  ;;  %vm4042_vm6 = vcmp.eq.f32.partialorder %v3071_v55, %v3288_v17  ;;  %vm4043_vm7 = vcmp.eq.f32.partialorder %v3074_v20, %v3290_v16 }
 0x248   : >>> { %v1237_v37 = vsel %vm4040_vm5, %v4038_v57, 128  ;;  %v1238_v52 = vsel %vm4042_vm6, %v4041_v40, 128  ;;  %v1239_v11 = vsel %vm4043_vm7, %v4041_v40, 128  ;;  %vm4045_vm8 = vcmp.eq.f32.partialorder %v3141_v38, %v3288_v17 }
 0x249   : >>> { %v1240_v42 = vsel %vm4045_vm8, %v4044_v1, 128  ;;  %vm4046_vm9 = vcmp.eq.f32.partialorder %v3144_v39, %v3290_v16  ;;  %vm4048_vm1 = vcmp.eq.f32.partialorder %v3159_v29, %v3288_v17  ;;  %vm4049_vm2 = vcmp.eq.f32.partialorder %v3162_v59, %v3290_v16 }
 0x24a   : >>> { %v1241_v61 = vsel %vm4046_vm9, %v4044_v1, 128  ;;  %v1242_v55 = vsel %vm4048_vm1, %v4047_v43, 128  ;;  %v1243_v20 = vsel %vm4049_vm2, %v4047_v43, 128  ;;  %vm4051_vm3 = vcmp.eq.f32.partialorder %v3147_v56, %v3288_v17 }
 0x24b   : >>> { %v1244_v38 = vsel %vm4051_vm3, %v4050_v34, 128  ;;  %vm4052_vm4 = vcmp.eq.f32.partialorder %v3150_v45, %v3290_v16  ;;  %vm4054_vm5 = vcmp.eq.f32.partialorder %v3239_v51, %v3288_v17  ;;  %vm4055_vm6 = vcmp.eq.f32.partialorder %v3242_v54, %v3290_v16 }
 0x24c   : >>> { %v1245_v39 = vsel %vm4052_vm4, %v4050_v34, 128  ;;  %v1246_v29 = vsel %vm4054_vm5, %v4053_v27, 128  ;;  %v1247_v59 = vsel %vm4055_vm6, %v4053_v27, 128  ;;  %vm4057_vm7 = vcmp.eq.f32.partialorder %v3245_v31, %v3288_v17 }
 0x24d   : >>> { %v1248_v56 = vsel %vm4057_vm7, %v4056_v32, 128  ;;  %v1249_v45 = vsel %vm1217_vm12, %v4056_v32, 128  ;;  %v1250_v51 = vsel %vm1218_vm13, %v4058_v18, 128  ;;  %v1251_v54 = vsel %vm1219_vm14, %v4058_v18, 128 }
 0x24e   : >>> { %v1252_v31 = vsel %vm1220_vm15, %v4059_v28, 128  ;;  %v1253_v49 = vsel %vm1221_vm0, %v4059_v28, 128  ;;  %v1254_v12 = vsel %vm1222_vm10, %v4060_v60, 128  ;;  %v1255_v47 = vsel %vm1223_vm11, %v4060_v60, 128 }
 0x24f   : >>> { %vm1256_vm12 = vcmp.lt.s32.totalorder %v1224_v33, %v1228_v7  ;;  %vm1258_vm13 = vcmp.lt.s32.totalorder %v1226_v14, %v1230_v35  ;;  %vm1295_vm14 = vcmp.lt.s32.totalorder %v1225_v9, %v1229_v48  ;;  %vm1297_vm8 = vcmp.lt.s32.totalorder %v1227_v26, %v1231_v21 }
 0x250   : >>> { %v1257_v63 = vsel %vm1256_vm12, %v1224_v33, %v1228_v7  ;;  %v1259_v22 = vsel %vm1258_vm13, %v1226_v14, %v1230_v35  ;;  %v1296_v53 = vsel %vm1295_vm14, %v1225_v9, %v1229_v48  ;;  %v1298_v5 = vsel %vm1297_vm8, %v1227_v26, %v1231_v21 }
 0x251   : >>> { %vm1260_vm15 = vcmp.lt.s32.totalorder %v1257_v63, %v1232_v8  ;;  %vm1262_vm0 = vcmp.lt.s32.totalorder %v1259_v22, %v1234_v50  ;;  %vm1299_vm9 = vcmp.lt.s32.totalorder %v1296_v53, %v1233_v25  ;;  %vm1301_vm1 = vcmp.lt.s32.totalorder %v1298_v5, %v1235_v10 }
 0x252   : >>> { %v1261_v36 = vsel %vm1260_vm15, %v1257_v63, %v1232_v8  ;;  %v1263_v4 = vsel %vm1262_vm0, %v1259_v22, %v1234_v50  ;;  %v1300_v17 = vsel %vm1299_vm9, %v1296_v53, %v1233_v25  ;;  %v1302_v13 = vsel %vm1301_vm1, %v1298_v5, %v1235_v10 }
 0x253   : >>> { %vm1264_vm10 = vcmp.lt.s32.totalorder %v1261_v36, %v1236_v3  ;;  %vm1266_vm2 = vcmp.lt.s32.totalorder %v1263_v4, %v1238_v52  ;;  %vm1303_vm3 = vcmp.lt.s32.totalorder %v1300_v17, %v1237_v37  ;;  %vm1305_vm11 = vcmp.lt.s32.totalorder %v1302_v13, %v1239_v11 }
 0x254   : >>> { %v1265_v2 = vsel %vm1264_vm10, %v1261_v36, %v1236_v3  ;;  %v1267_v16 = vsel %vm1266_vm2, %v1263_v4, %v1238_v52  ;;  %v1304_v15 = vsel %vm1303_vm3, %v1300_v17, %v1237_v37  ;;  %v1306_v24 = vsel %vm1305_vm11, %v1302_v13, %v1239_v11 }
 0x255   : >>> { %vm1268_vm4 = vcmp.lt.s32.totalorder %v1265_v2, %v1240_v42  ;;  %vm1270_vm5 = vcmp.lt.s32.totalorder %v1267_v16, %v1242_v55  ;;  %vm1307_vm6 = vcmp.lt.s32.totalorder %v1304_v15, %v1241_v61  ;;  %vm1309_vm7 = vcmp.lt.s32.totalorder %v1306_v24, %v1243_v20 }
 0x256   : >>> { %v1269_v33 = vsel %vm1268_vm4, %v1265_v2, %v1240_v42  ;;  %v1271_v9 = vsel %vm1270_vm5, %v1267_v16, %v1242_v55  ;;  %v1308_v14 = vsel %vm1307_vm6, %v1304_v15, %v1241_v61  ;;  %v1310_v26 = vsel %vm1309_vm7, %v1306_v24, %v1243_v20 }
 0x257   : >>> { %vm1272_vm12 = vcmp.lt.s32.totalorder %v1269_v33, %v1244_v38  ;;  %vm1274_vm13 = vcmp.lt.s32.totalorder %v1271_v9, %v1246_v29  ;;  %vm1311_vm14 = vcmp.lt.s32.totalorder %v1308_v14, %v1245_v39  ;;  %vm1313_vm8 = vcmp.lt.s32.totalorder %v1310_v26, %v1247_v59 }
 0x258   : >>> { %v1273_v5 = vsel %vm1272_vm12, %v1269_v33, %v1244_v38  ;;  %v1275_v7 = vsel %vm1274_vm13, %v1271_v9, %v1246_v29  ;;  %v1312_v48 = vsel %vm1311_vm14, %v1308_v14, %v1245_v39  ;;  %v1314_v35 = vsel %vm1313_vm8, %v1310_v26, %v1247_v59  ;;  %v4093_v14 = vld [vmem:[#allocation21_spill] sm:$0xff]  ;;  %v2329_v26 = vld [vmem:[%s2824_s16] sm:$0xff] }
 0x259   : >>> { %vm1276_vm15 = vcmp.lt.s32.totalorder %v1273_v5, %v1248_v56  ;;  %vm1278_vm0 = vcmp.lt.s32.totalorder %v1275_v7, %v1250_v51  ;;  %vm1315_vm9 = vcmp.lt.s32.totalorder %v1312_v48, %v1249_v45  ;;  %vm1317_vm1 = vcmp.lt.s32.totalorder %v1314_v35, %v1251_v54 }
 0x25a   : >>> { %v1277_v13 = vsel %vm1276_vm15, %v1273_v5, %v1248_v56  ;;  %v1279_v21 = vsel %vm1278_vm0, %v1275_v7, %v1250_v51  ;;  %v1316_v8 = vsel %vm1315_vm9, %v1312_v48, %v1249_v45  ;;  %v1318_v25 = vsel %vm1317_vm1, %v1314_v35, %v1251_v54 }
 0x25b   : >>> { %vm1280_vm10 = vcmp.lt.s32.totalorder %v1277_v13, %v1252_v31  ;;  %vm1282_vm2 = vcmp.lt.s32.totalorder %v1279_v21, %v1254_v12  ;;  %vm1319_vm3 = vcmp.lt.s32.totalorder %v1316_v8, %v1253_v49  ;;  %vm1321_vm11 = vcmp.lt.s32.totalorder %v1318_v25, %v1255_v47 }
 0x25c   : >>> { %v1281_v15 = vsel %vm1280_vm10, %v1277_v13, %v1252_v31  ;;  %v1283_v24 = vsel %vm1282_vm2, %v1279_v21, %v1254_v12  ;;  %v1320_v50 = vsel %vm1319_vm3, %v1316_v8, %v1253_v49  ;;  %v1322_v10 = vsel %vm1321_vm11, %v1318_v25, %v1255_v47 }
 0x25d   : >>> { %vm1284_vm4 = vcmp.lt.s32.totalorder %v1281_v15, %v1283_v24  ;;  %vm1323_vm5 = vcmp.lt.s32.totalorder %v1320_v50, %v1322_v10  ;;  %v2407_v54 = vmov 1.0|1.0   ;;  %v4067_v49 = vmov 0 }
 0x25e   : >>> { %v1285_v3 = vsel %vm1284_vm4, %v1281_v15, %v1283_v24  ;;  %v1324_v37 = vsel %vm1323_vm5, %v1320_v50, %v1322_v10  ;;  %v4069_v12 = vmov 0  ;;  %v4071_v47 = vmov 0 }
 0x25f   : >>> { %v1286_v52 = vrot.slane %v1285_v3, 4  ;;  %v1325_v11 = vrot.slane %v1324_v37, 4  ;;  %v4073_v63 = vmov 0  ;;  %v1508_v5 = vcombine.high %v2329_v26, %v2329_v26 }
 0x260   : >>> { %v2408_v7 = vmov 1.0  }
 0x261   : >>> { %vm1287_vm6 = vcmp.lt.s32.totalorder %v1285_v3, %v1286_v52  ;;  %vm1326_vm7 = vcmp.lt.s32.totalorder %v1324_v37, %v1325_v11  ;;  %1574 = vmatprep.mubr.f32.mxu1 %v1508_v5 }
 0x262   : >>> { %v1288_v42 = vsel %vm1287_vm6, %v1285_v3, %v1286_v52  ;;  %v1327_v61 = vsel %vm1326_vm7, %v1324_v37, %v1325_v11  ;;  %v4098_v37 = vld [vmem:[#allocation50_spill] sm:$0xff] }
 0x263   : >>> { %v1289_v55 = vrot.slane %v1288_v42, 2  ;;  %v1328_v20 = vrot.slane %v1327_v61, 2 }
 0x265   : >>> { %vm1290_vm12 = vcmp.lt.s32.totalorder %v1288_v42, %v1289_v55  ;;  %vm1329_vm13 = vcmp.lt.s32.totalorder %v1327_v61, %v1328_v20 }
 0x266   : >>> { %v1291_v38 = vsel %vm1290_vm12, %v1288_v42, %v1289_v55  ;;  %v1330_v39 = vsel %vm1329_vm13, %v1327_v61, %v1328_v20  ;;  %v4099_v42 = vld [vmem:[#allocation51_spill] sm:$0xff] }
 0x267   : >>> { %v1292_v29 = vrot.slane %v1291_v38, 1  ;;  %v1331_v59 = vrot.slane %v1330_v39, 1 }
 0x269   : >>> { %vm1293_vm14 = vcmp.lt.s32.totalorder %v1291_v38, %v1292_v29  ;;  %vm1332_vm8 = vcmp.lt.s32.totalorder %v1330_v39, %v1331_v59 }
 0x26a   : >>> { %v3484_v56 = vsel %vm1293_vm14, %v1291_v38, %v1292_v29  ;;  %v3486_v45 = vsel %vm1332_vm8, %v1330_v39, %v1331_v59 }
 0x26b   : >>> { %vm1335_vm15 = vcmp.eq.s32.totalorder %v4028_v62, %v3486_v45  ;;  %vm1337_vm0 = vcmp.eq.s32.totalorder %v4030_v23, %v3486_v45  ;;  %vm1334_vm9 = vcmp.eq.s32.totalorder %v4028_v62, %v3484_v56  ;;  %vm1336_vm1 = vcmp.eq.s32.totalorder %v4030_v23, %v3484_v56 }
 0x26c   : >>> { %vm3496_vm10 = vmpackc.low %vm1337_vm0, %vm1335_vm15  ;;  %vm1339_vm2 = vcmp.eq.s32.totalorder %v4031_v58, %v3486_v45  ;;  %vm1341_vm3 = vcmp.eq.s32.totalorder %v4032_v6, %v3486_v45  ;;  %vm1338_vm5 = vcmp.eq.s32.totalorder %v4031_v58, %v3484_v56  ;;  %vm1340_vm6 = vcmp.eq.s32.totalorder %v4032_v6, %v3484_v56 }
 0x26d   : >>> { %2121 = vmatprep.subr.msk.bf16.mxu0 %vm3496_vm10, %v2407_v54  ;;  %2153 = vmatprep.subr.msk.bf16.mxu1 %vm3496_vm10, %v2407_v54  ;;  %vm3510_vm11 = vmpackc.low %vm1336_vm1, %vm1334_vm9  ;;  %vm1343_vm7 = vcmp.eq.s32.totalorder %v4033_v19, %v3486_v45  ;;  %vm1345_vm12 = vcmp.eq.s32.totalorder %v4035_v0, %v3486_v45  ;;  %vm1342_vm8 = vcmp.eq.s32.totalorder %v4033_v19, %v3484_v56 }
 0x26e   : >>> { %2123 = vmatpush1.bf16.msk.msra.mxu0 %vm3510_vm11, %v2407_v54  ;;  %2155 = vmatpush1.bf16.xpose.msk.msra.mxu1 %vm3510_vm11, %v2407_v54  ;;  %vm3520_vm4 = vmpackc.low %vm1341_vm3, %vm1339_vm2  ;;  %vm1344_vm15 = vcmp.eq.s32.totalorder %v4035_v0, %v3484_v56  ;;  %vm1347_vm0 = vcmp.eq.s32.totalorder %v4038_v57, %v3486_v45  ;;  %vm1349_vm9 = vcmp.eq.s32.totalorder %v4041_v40, %v3486_v45 }
 0x26f   : >>> { %2125 = vmatprep.subr.msk.bf16.mxu0 %vm3520_vm4, %v2407_v54  ;;  %2157 = vmatprep.subr.msk.bf16.mxu1 %vm3520_vm4, %v2407_v54  ;;  %vm3538_vm13 = vmpackc.low %vm1340_vm6, %vm1338_vm5  ;;  %vm1346_vm3 = vcmp.eq.s32.totalorder %v4038_v57, %v3484_v56  ;;  %vm1348_vm5 = vcmp.eq.s32.totalorder %v4041_v40, %v3484_v56  ;;  %vm1351_vm6 = vcmp.eq.s32.totalorder %v4044_v1, %v3486_v45 }
 0x270   : >>> { %v4068_v49 = vsel %vm3538_vm13, 4294967295, %v4067_v49  ;;  %vm3545_vm14 = vmpackc.low %vm1345_vm12, %vm1343_vm7  ;;  %vm1353_vm7 = vcmp.eq.s32.totalorder %v4047_v43, %v3486_v45 }
 0x271   : >>> { %v4070_v12 = vsel %vm3545_vm14, 4294967295, %v4069_v12  ;;  %vm3560_vm1 = vmpackc.low %vm1344_vm15, %vm1342_vm8  ;;  %vm1350_vm15 = vcmp.eq.s32.totalorder %v4044_v1, %v3484_v56 }
 0x272   : >>> { %2127 = vmatpush1.bf16.msk.msra.mxu0 %vm3538_vm13, %v2407_v54  ;;  %v4072_v47 = vsel %vm3560_vm1, 4294967295, %v4071_v47  ;;  %vm3570_vm2 = vmpackc.low %vm1349_vm9, %vm1347_vm0  ;;  %vm1352_vm0 = vcmp.eq.s32.totalorder %v4047_v43, %v3484_v56  ;;  %vm1355_vm9 = vcmp.eq.s32.totalorder %v4050_v34, %v3486_v45 }
 0x273   : >>> { %2129 = vmatprep.subr.msk.bf16.mxu0 %vm3545_vm14, %v2407_v54  ;;  %v4074_v63 = vsel %vm3570_vm2, 4294967295, %v4073_v63  ;;  %vm3588_vm12 = vmpackc.low %vm1348_vm5, %vm1346_vm3  ;;  %vm1357_vm3 = vcmp.eq.s32.totalorder %v4053_v27, %v3486_v45 }
 0x274   : >>> { %vm3595_vm8 = vmpackc.low %vm1353_vm7, %vm1351_vm6  ;;  %vm1354_vm7 = vcmp.eq.s32.totalorder %v4050_v34, %v3484_v56 }
 0x275   : >>> { %vm3610_vm5 = vmpackc.low %vm1352_vm0, %vm1350_vm15  ;;  %vm1356_vm15 = vcmp.eq.s32.totalorder %v4053_v27, %v3484_v56  ;;  %vm1359_vm0 = vcmp.eq.s32.totalorder %v4056_v32, %v3486_v45 }
 0x276   : >>> { %2131 = vmatpush1.bf16.msk.msra.mxu0 %vm3560_vm1, %v2407_v54  ;;  %2159 = vmatpush1.bf16.xpose.msk.msra.mxu1 %vm3538_vm13, %v2407_v54  ;;  %vm3620_vm6 = vmpackc.low %vm1357_vm3, %vm1355_vm9  ;;  %vm1361_vm9 = vcmp.eq.s32.totalorder %v4058_v18, %v3486_v45  ;;  %vm1362_vm13 = vcmp.eq.s32.totalorder %v4059_v28, %v3484_v56 }
 0x277   : >>> { %2133 = vmatprep.subr.msk.bf16.mxu0 %vm3570_vm2, %v2407_v54  ;;  %2161 = vmatprep.subr.msk.bf16.mxu1 %vm3545_vm14, %v2407_v54  ;;  %vm3638_vm3 = vmpackc.low %vm1356_vm15, %vm1354_vm7  ;;  %vm1360_vm14 = vcmp.eq.s32.totalorder %v4058_v18, %v3484_v56  ;;  %vm1363_vm7 = vcmp.eq.s32.totalorder %v4059_v28, %v3486_v45  ;;  %vm1365_vm15 = vcmp.eq.s32.totalorder %v4060_v60, %v3486_v45 }
 0x27a   : >>> { %2135 = vmatpush1.bf16.msk.msra.mxu0 %vm3588_vm12, %v2407_v54 }
 0x27b   : >>> { %2137 = vmatprep.subr.msk.bf16.mxu0 %vm3595_vm8, %v2407_v54 }
 0x27e   : >>> { %2139 = vmatpush1.bf16.msk.msra.mxu0 %vm3610_vm5, %v2407_v54  ;;  %2163 = vmatpush1.bf16.xpose.msk.msra.mxu1 %vm3560_vm1, %v2407_v54  ;;  %vm3645_vm1 = vmpackc.low %vm1361_vm9, %vm1359_vm0 }
 0x27f   : >>> { %2141 = vmatprep.subr.msk.bf16.mxu0 %vm3620_vm6, %v2407_v54  ;;  %2165 = vmatprep.subr.msk.bf16.mxu1 %vm3570_vm2, %v2407_v54  ;;  %vm1358_vm2 = vcmp.eq.s32.totalorder %v4056_v32, %v3484_v56  ;;  %vm3670_vm9 = vmpackc.low %vm1365_vm15, %vm1363_vm7 }
 0x280   : >>> { %vm3660_vm0 = vmpackc.low %vm1360_vm14, %vm1358_vm2  ;;  %vm1364_vm14 = vcmp.eq.s32.totalorder %v4060_v60, %v3484_v56 }
 0x281   : >>> { %vm3684_vm2 = vmpackc.low %vm1364_vm14, %vm1362_vm13  ;;  %vm4095_vm13 = vnez %v4070_v12 }
 0x282   : >>> { %2143 = vmatpush1.bf16.msk.msra.mxu0 %vm3638_vm3, %v2407_v54 }
 0x283   : >>> { %2145 = vmatprep.subr.msk.bf16.mxu0 %vm3645_vm1, %v2407_v54 }
 0x286   : >>> { %2147 = vmatpush1.bf16.msk.msra.mxu0 %vm3660_vm0, %v2407_v54  ;;  %2167 = vmatpush1.bf16.xpose.msk.msra.mxu1 %vm3588_vm12, %v2407_v54 }
 0x287   : >>> { %2149 = vmatprep.subr.msk.bf16.mxu0 %vm3670_vm9, %v2407_v54  ;;  %2169 = vmatprep.subr.msk.bf16.mxu1 %vm3595_vm8, %v2407_v54 }
 0x28a   : >>> { %2151 = vmatpush1.bf16.msk.msra.mxu0 %vm3684_vm2, %v2407_v54 }
 0x28b   : >>> { %2185 = vmatprep.subr.msk.bf16.mxu0 %vm3496_vm10, %v2407_v54  ;;  %vm4094_vm10 = vnez %v4068_v49 }
 0x28d   : >>> { %1495 = vmatmul.mubr.f32.vlgmr.msra.gmra.mrb[0].mxu0 %v4093_v14 }
 0x28e   : >>> { %2171 = vmatpush1.bf16.xpose.msk.msra.mxu1 %vm3610_vm5, %v2407_v54  ;;  %1645 = vmatprep.mubr.f32.mxu0 %v2408_v7 }
 0x28f   : >>> { %2173 = vmatprep.subr.msk.bf16.mxu1 %vm3620_vm6, %v2407_v54 }
 0x293   : >>> { %2187 = vmatpush1.bf16.xpose.msk.msra.mxu0 %vm3510_vm11, %v2407_v54  ;;  %vm4096_vm11 = vnez %v4072_v47 }
 0x294   : >>> { %2189 = vmatprep.subr.msk.bf16.mxu0 %vm3520_vm4, %v2407_v54  ;;  %vm4097_vm4 = vnez %v4074_v63 }
 0x296   : >>> { %2175 = vmatpush1.bf16.xpose.msk.msra.mxu1 %vm3638_vm3, %v2407_v54 }
 0x297   : >>> { %2177 = vmatprep.subr.msk.bf16.mxu1 %vm3645_vm1, %v2407_v54 }
 0x29b   : >>> { %2191 = vmatpush1.bf16.xpose.msk.msra.mxu0 %vm4094_vm10, %v2407_v54 }
 0x29c   : >>> { %2193 = vmatprep.subr.msk.bf16.mxu0 %vm4095_vm13, %v2407_v54 }
 0x29e   : >>> { %2179 = vmatpush1.bf16.xpose.msk.msra.mxu1 %vm3660_vm0, %v2407_v54 }
 0x29f   : >>> { %2181 = vmatprep.subr.msk.bf16.mxu1 %vm3670_vm9, %v2407_v54 }
 0x2a3   : >>> { %2195 = vmatpush1.bf16.xpose.msk.msra.mxu0 %vm4096_vm11, %v2407_v54 }
 0x2a4   : >>> { %2197 = vmatprep.subr.msk.bf16.mxu0 %vm4097_vm4, %v2407_v54 }
 0x2a6   : >>> { %2183 = vmatpush1.bf16.xpose.msk.msra.mxu1 %vm3684_vm2, %v2407_v54 }
 0x2ab   : >>> { %2199 = vmatpush1.bf16.xpose.msk.msra.mxu0 %vm3588_vm12, %v2407_v54 }
 0x2ac   : >>> { %2201 = vmatprep.subr.msk.bf16.mxu0 %vm3595_vm8, %v2407_v54 }
 0x2ad   : >>> { %1575 = vmatmul.mubr.f32.vlgmr.msra.gmra.mrb[0].mxu1 %v2329_v26 }
 0x2b3   : >>> { %2203 = vmatpush1.bf16.xpose.msk.msra.mxu0 %vm3610_vm5, %v2407_v54 }
 0x2b4   : >>> { %2205 = vmatprep.subr.msk.bf16.mxu0 %vm3620_vm6, %v2407_v54 }
 0x2bb   : >>> { %2207 = vmatpush1.bf16.xpose.msk.msra.mxu0 %vm3638_vm3, %v2407_v54 }
 0x2bc   : >>> { %2209 = vmatprep.subr.msk.bf16.mxu0 %vm3645_vm1, %v2407_v54  ;;  %vm1657_vm1 = vcmask 1043456  }
 0x2c3   : >>> { %2211 = vmatpush1.bf16.xpose.msk.msra.mxu0 %vm3660_vm0, %v2407_v54 }
 0x2c4   : >>> { %2213 = vmatprep.subr.msk.bf16.mxu0 %vm3670_vm9, %v2407_v54 }
 0x2cb   : >>> { %2215 = vmatpush1.bf16.xpose.msk.msra.mxu0 %vm3684_vm2, %v2407_v54 }
 0x2d2   : >>> { %1646 = vmatmul.mubr.f32.vlgmr.msra.gmra.mrb[2].mxu0 %v2408_v7 }
 0x360   : >>> { %v1496_v48 = vpop.f32.mrb[0].mxu0 }
 0x361   : >>> { %v1498_v35 = vpop.f32.mrb[1].mxu0 }
 0x362   : >>> { %v1503_v13 = vcombine.low %v1496_v48, %v1498_v35 }
 0x364   : >>> { %1507 = vst [vmem:[%s1506_s13] sm:$0xff] %v1503_v13  ;;  %v1652_v21 = vsub.f32 %v2329_v26, %v1503_v13 }
 0x366   : >>> { %v1653_v8 = vmul.f32 %v1652_v21, %v1652_v21 }
 0x368   : >>> { %v1655_v25 = vcombine.high %v1653_v8, %v1653_v8  ;;  %v1658_v15 = vsel %vm1657_vm1, %v1653_v8, 0.0 }
 0x36a   : >>> { %v1659_v24 = vsel %vm1657_vm1, %v1655_v25, 0.0 }
 0x36b   : >>> { %v1660_v50 = vadd.f32 %v1659_v24, %v1658_v15 }
 0x36d   : >>> { %1661 = vadd.xlane.f32.xlu1 %v1660_v50 }
 0x380   : >>> { %v1576_v3 = vpop.f32.mrb[0].mxu1 }
 0x381   : >>> { %v1580_v61 = vadd.f32 %v4099_v42, %v1576_v3   ;;  %v1578_v55 = vpop.f32.mrb[1].mxu1 }
 0x383   : >> { %1672 = vst [vmem:[%s1671_s30] sm:$0xf] (%p504_p12), %v1580_v61 }
 0x3a5   : >>> { %v1647_v10 = vpop.f32.mrb[2].mxu0 }
 0x3a6   : >>> { %v1651_v52 = vadd.f32 %v4098_v37, %v1647_v10   ;;  %v1649_v11 = vpop.f32.mrb[3].mxu0 }
 0x3a8   : >>> { %v4101_v53 = vmov %v1651_v52 }
 0x3fa   : >>> { %v1662_v20 = vpop.xlane.xlu1 %1661 }
 0x3fb   : >>> { %v1663_v38 = vrot.slane %v1662_v20, 4 }
 0x3fd   : >>> { %v1664_v39 = vadd.f32 %v1663_v38, %v1662_v20 }
 0x3ff   : >>> { %v1665_v29 = vrot.slane %v1664_v39, 2 }
 0x401   : >>> { %v1666_v59 = vadd.f32 %v1665_v29, %v1664_v39 }
 0x403   : >>> { %v1667_v56 = vrot.slane %v1666_v59, 1 }
 0x405   : >>> { %v1668_v45 = vadd.f32 %v1667_v56, %v1666_v59  ;;  %v4102_v56 = vmov %v1580_v61 }
 0x407   : >>> { %2216 = vpush %v1668_v45 }
 0x435   : >> { %506 = sbr.rel (!%p504_p12) target bundleno = 228 (0xe4), region = 205 }
 0x438   : >>> { %s2217_s16 = spop %2216 }
 0x439   : >>> { %s1670_s23 = sadd.f32 %s2388_s9, %s2217_s16   ;;  %s1673_s16 = scalar_lea.vmem (%p504_p12), %s387_s10, %s2384_s21 }
 0x43a   : >> { %1674 = vst [vmem:[%s1673_s16] sm:$0x1] (%p504_p12), %v1651_v52  ;;  %s414_s21 = sadd.s32 (%p504_p12), 1, %s2384_s21  }
 0x43b   : >>> { %s4100_s9 = smov %s1670_s23  ;;  %s1675_s17 = sadd.f32 (%p504_p12), %s2380_s19, %s1670_s23  }
 0x43c   : >> { %p411_p13 = scmp.ge.s32.totalorder %s414_s21, 4  }
 0x43d   : >> { %s4103_s19 = smov %s1675_s17  ;;  %v1676_v41 = vstv (%p411_p13), %s1675_s17  ;;  %vm1677_vm12 = vcmask (%p411_p13), 0   ;;  %s4104_s12 = scalar_lea.vmem (%p411_p13), %s3827_s6, %s2565_s11 }
 0x43e   : > { %413 = sbr.rel (!%p411_p13) target bundleno = 50 (0x32), region = 216  ;;  %1678 = vst.msk [vmem:[%s4104_s12] sm:$0x1] (%p411_p13), %vm1677_vm12, %v1676_v41 }
 0x445   : > { %1697 = sbr.rel (!%p2475_p5) target bundleno = 1100 (0x44c), region = 88  ;;  %s2119_s14 = sshll.u32 (%p2475_p5), %s2460_s24, 5  ;;  %v1743_v44 = vld [vmem:[%s2573_s18] sm:$0xff] (%p2475_p5)  ;;  %v1745_v46 = vld [vmem:[%s2573_s18 + $0x8] sm:$0xff] (%p2475_p5)  ;;  %v1747_v30 = vld [vmem:[%s2573_s18 + $0x10] sm:$0xff] (%p2475_p5) }
 0x446   : > { %s1701_s26 = scalar_lea.vmem (%p2475_p5), %s3824_s3, %s2119_s14  ;;  %v1749_v23 = vld [vmem:[%s2573_s18 + $0x18] sm:$0xff] (%p2475_p5)  ;;  %v1751_v58 = vld [vmem:[%s2573_s18 + $0x20] sm:$0xff] (%p2475_p5)  ;;  %v1753_v6 = vld [vmem:[%s2573_s18 + $0x28] sm:$0xff] (%p2475_p5) }
 0x447   : > { %1744 = vst [vmem:[%s1701_s26] sm:$0xff] (%p2475_p5), %v1743_v44  ;;  %1746 = vst [vmem:[%s1701_s26 + $0x8] sm:$0xff] (%p2475_p5), %v1745_v46  ;;  %v1755_v19 = vld [vmem:[%s2573_s18 + $0x30] sm:$0xff] (%p2475_p5)  ;;  %v1757_v0 = vld [vmem:[%s2573_s18 + $0x38] sm:$0xff] (%p2475_p5) }
 0x448   : > { %1748 = vst [vmem:[%s1701_s26 + $0x10] sm:$0xff] (%p2475_p5), %v1747_v30  ;;  %1750 = vst [vmem:[%s1701_s26 + $0x18] sm:$0xff] (%p2475_p5), %v1749_v23 }
 0x449   : > { %1752 = vst [vmem:[%s1701_s26 + $0x40] sm:$0xff] (%p2475_p5), %v1751_v58  ;;  %1754 = vst [vmem:[%s1701_s26 + $0x48] sm:$0xff] (%p2475_p5), %v1753_v6 }
 0x44a   : > { %1756 = vst [vmem:[%s1701_s26 + $0x50] sm:$0xff] (%p2475_p5), %v1755_v19  ;;  %1758 = vst [vmem:[%s1701_s26 + $0x58] sm:$0xff] (%p2475_p5), %v1757_v0 }
 0x44c PF: > { %p14_p0 = scmp.ge.s32.totalorder %s2463_s25, 4   ;;  %s4105_s21 = smov %s2372_s22 }
 0x44d   : > { %s4106_s22 = smov %s2473_s28  ;;  %s4107_s23 = smov %s2463_s25 }
 0x44e   :  { %16 = sbr.rel (!%p14_p0) target bundleno = 2 (0x2), region = 227 }

</bundles_post_ra>
